<compile_context>
chip_gen: v6e
topology: v6e:2x2x1
jax: 0.10.0
libtpu: 0.0.40
codegen_flags: <defaults>
</compile_context>

<pallas_src>
import jax
import jax.numpy as jnp
import numpy as np
from jax.experimental import pallas as pl
from jax.experimental.pallas import tpu as pltpu


def make_gvae_kernel(num_hidden_gc: int, normalize: bool, *, G: int, N: int,
                     U: int, compute_dtype=jnp.bfloat16):
    """Fused GVAE forward kernel: U groups of G*N stacked rows per grid step."""
    GN = G * N
    n_params = 2 * num_hidden_gc + 4   # (W,b) per hidden, fused (Wmulv,bmulv), (Wdec,bdec)
    f32 = jnp.float32
    cd = compute_dtype

    def kernel(*refs):
        sel_ref, mask_ref, ops_ref, adj_ref = refs[:4]
        param_refs = refs[4:4 + n_params]
        fused_ref, adjdiag_ref = refs[4 + n_params:]

        # Hoist parameter loads/casts out of the per-group loop (tiny tensors).
        hidden = [(param_refs[2 * k][...].astype(cd),
                   param_refs[2 * k + 1][...].astype(f32))
                  for k in range(num_hidden_gc)]
        wmlv = param_refs[2 * num_hidden_gc][...].astype(cd)
        bmlv = param_refs[2 * num_hidden_gc + 1][...].astype(f32)
        wdec = param_refs[2 * num_hidden_gc + 2][...].astype(cd)
        bdec = param_refs[2 * num_hidden_gc + 3][...].astype(f32)

        sel = sel_ref[...]     # (N, GN)  0/1 selector: sel[m, j] = (j % N == m)
        mask = mask_ref[...]   # (GN, GN) 0/1 block-diagonal mask

        dz = wmlv.shape[-1] // 2

        # Small static U -> fully-unrolled loop over independent 128-row groups.
        for u in range(U):
            r0, r1 = u * GN, (u + 1) * GN

            # ---- build the (GN, GN) block-diagonal adjacency (f32, exact) ----
            a_rows = adj_ref[r0:r1, :].astype(f32)                        # (GN, N)
            a_tiled = jnp.dot(a_rows, sel, preferred_element_type=f32)    # (GN, GN)
            A = a_tiled * mask                                            # block-diag

            if normalize:
                # DAD[i,j] = A[i,j] / sqrt(colsum[i]) / sqrt(rowsum[j])
                # rowsum comes straight from the (GN, N) rows (16x cheaper reduce).
                rowsum = jnp.sum(a_rows, axis=1, keepdims=True)           # (GN, 1)
                colsum = jnp.sum(A, axis=0, keepdims=True)                # (1, GN)
                rowsum = jnp.where(rowsum == 0.0, 1e-10, rowsum)
                colsum = jnp.where(colsum == 0.0, 1e-10, colsum)
                A = A * jnp.transpose(jax.lax.rsqrt(colsum))              # scale rows
                A = A * jnp.transpose(jax.lax.rsqrt(rowsum))              # scale cols
            A_c = A.astype(cd)

            # ---- graph convolution: relu(A @ (x @ W)) + b  (W pre-transposed) ----
            def gc(x, w, b):
                support = jnp.dot(x.astype(cd), w, preferred_element_type=f32)
                agg = jnp.dot(A_c, support.astype(cd), preferred_element_type=f32)
                return jnp.maximum(agg, 0.0) + b

            x = ops_ref[r0:r1, :].astype(f32)                             # (GN, Din)
            for w, b in hidden:                                           # encoder.gcs[:-1]
                x = gc(x, w, b)

            mulv = gc(x, wmlv, bmlv)                                      # (GN, 2*Dz) = [mu|logvar]
            z = mulv[:, :dz]                                              # eval: z = mu

            # ---- decoder ----
            ops_recon = jax.nn.sigmoid(
                jnp.dot(z.astype(cd), wdec, preferred_element_type=f32) + bdec)

            # One fused per-row output slab: [mu | logvar | ops_recon]
            fused_ref[r0:r1, :] = jnp.concatenate([mulv, ops_recon], axis=1)

            # sigmoid(z z^T): mask off-block logits, compact the block-diagonal
            # with the selector matmul -> lane-dense (N, GN) slab, then sigmoid.
            zc = z.astype(cd)
            adj_logits = jnp.einsum('nd,md->nm', zc, zc,
                                    preferred_element_type=f32)           # (GN, GN)
            diag_slab = jnp.dot(sel, adj_logits * mask,
                                preferred_element_type=f32)               # (N, GN)
            adjdiag_ref[u * N:(u + 1) * N, :] = jax.nn.sigmoid(diag_slab)

    return kernel


def init_gvae_params(key, dims):
    """Deterministic parameter init mirroring the module's parameter shapes (PyTorch layout)."""
    params = []
    num_hidden = len(dims) - 2
    keys = jax.random.split(key, 2 * (num_hidden + 3))
    ki = 0

    def lin(kw, kb, out_f, in_f):
        std = 1.0 / np.sqrt(in_f)
        w = jax.random.uniform(kw, (out_f, in_f), jnp.float32, -std, std)
        b = jax.random.uniform(kb, (1, out_f), jnp.float32, -std, std)
        return w, b

    for k in range(num_hidden):                      # encoder.gcs[:-1]: dims[k] -> dims[k+1]
        w, b = lin(keys[ki], keys[ki + 1], dims[k + 1], dims[k]); ki += 2
        params += [w, b]
    for _ in range(2):                               # gc_mu, gc_logvar: dims[-2] -> dims[-1]
        w, b = lin(keys[ki], keys[ki + 1], dims[-1], dims[-2]); ki += 2
        params += [w, b]
    w, b = lin(keys[ki], keys[ki + 1], dims[0], dims[-1]); ki += 2   # decoder Linear
    params += [w, b]
    return params


def prepare_params(params, dims):
    """Pre-transpose weights to (in, out) and fuse gc_mu / gc_logvar — done once in the wrapper."""
    num_hidden = len(dims) - 2
    prepped = []
    idx = 0
    for _ in range(num_hidden):
        w, b = params[idx], params[idx + 1]; idx += 2
        prepped += [w.T, b]                                   # (in, out), (1, out)
    wmu, bmu = params[idx], params[idx + 1]; idx += 2
    wlv, blv = params[idx], params[idx + 1]; idx += 2
    prepped += [jnp.concatenate([wmu.T, wlv.T], axis=1),      # (in, 2*Dz)
                jnp.concatenate([bmu, blv], axis=1)]          # (1, 2*Dz)
    wdec, bdec = params[idx], params[idx + 1]
    prepped += [wdec.T, bdec]                                 # (Dz, Din), (1, Din)
    return prepped


def _choose_tiling(B, N, group=None, unroll=None):
    # G*N ~= 128 stacked rows per group (full-width MXU matmuls), G*N % 8 == 0.
    if group is None:
        G = max(1, 128 // N)
        while (G * N) % 8 != 0:
            G += 1
    else:
        G = group
    ngroups = -(-B // G)                     # cdiv
    if unroll is None:
        # Amortize per-step pipeline overhead, but keep grid extent >= 2 so
        # dimension_semantics=("parallel",) can feed both v7x TensorCores.
        U = 1 if ngroups < 4 else min(8, max(1, ngroups // 2))
    else:
        U = unroll
    while (U * N) % 8 != 0:                  # keep adj-diag output block sublane-aligned
        U += 1
    nsteps = -(-ngroups // U)
    return G, U, nsteps


def gvae_forward(ops, adj, params, dims, normalize=True,
                 compute_dtype=jnp.bfloat16, group=None, unroll=None):
    B, N, Din = ops.shape
    Dz = dims[-1]
    num_hidden = len(dims) - 2

    G, U, nsteps = _choose_tiling(B, N, group, unroll)
    GN = G * N
    Bp = nsteps * U * G
    if Bp != B:                              # pad batch (padded graphs sliced off below)
        pad = Bp - B
        ops = jnp.pad(ops, ((0, pad), (0, 0), (0, 0)))
        adj = jnp.pad(adj, ((0, pad), (0, 0), (0, 0)))

    # Wrapper-side (free) layout plumbing: flatten graphs into stacked rows.
    ops2 = ops.reshape(Bp * N, Din)
    adj2 = adj.reshape(Bp * N, N)
    prepped = prepare_params(params, dims)

    # Grid-invariant constants hoisted out of the kernel (constant index_map
    # -> DMA'd only once; never rebuilt per step with iotas).
    lanes = np.arange(GN)
    sel = jnp.asarray((lanes[None, :] % N == np.arange(N)[:, None]).astype(np.float32))   # (N, GN)
    blkmask = jnp.asarray((lanes[:, None] // N == lanes[None, :] // N).astype(np.float32))  # (GN, GN)

    W = 2 * Dz + Din                         # fused per-row output width [mu|logvar|ops_recon]
    kernel = make_gvae_kernel(num_hidden, normalize, G=G, N=N, U=U,
                              compute_dtype=compute_dtype)

    in_specs = [
        pl.BlockSpec((N, GN), lambda s: (0, 0)),          # selector (constant)
        pl.BlockSpec((GN, GN), lambda s: (0, 0)),         # block-diag mask (constant)
        pl.BlockSpec((U * GN, Din), lambda s: (s, 0)),    # ops rows
        pl.BlockSpec((U * GN, N), lambda s: (s, 0)),      # adjacency rows
    ] + [pl.BlockSpec(p.shape, lambda s: (0, 0)) for p in prepped]

    out_shape = (
        jax.ShapeDtypeStruct((Bp * N, W), jnp.float32),           # [mu|logvar|ops_recon]
        jax.ShapeDtypeStruct((nsteps * U * N, GN), jnp.float32),  # compacted sigmoid(z z^T) diag blocks
    )
    out_specs = (
        pl.BlockSpec((U * GN, W), lambda s: (s, 0)),
        pl.BlockSpec((U * N, GN), lambda s: (s, 0)),
    )

    fused, adjdiag = pl.pallas_call(
        kernel,
        out_shape=out_shape,
        grid_spec=pltpu.PrefetchScalarGridSpec(
            num_scalar_prefetch=0,
            grid=(nsteps,),
            in_specs=in_specs,
            out_specs=out_specs,
        ),
        compiler_params=pltpu.CompilerParams(
            dimension_semantics=("parallel",)),
    )(sel, blkmask, ops2, adj2, *prepped)

    # ---- wrapper-side un-flattening (trivial reshapes only) ----
    fused = fused.reshape(Bp, N, W)[:B]
    mu = fused[..., :Dz]
    logvar = fused[..., Dz:2 * Dz]
    ops_recon = fused[..., 2 * Dz:]

    npg = Bp // G
    adj_recon = adjdiag.reshape(npg, N, G, N).transpose(0, 2, 1, 3).reshape(Bp, N, N)[:B]

    return ops_recon, adj_recon, mu, logvar


# ---- pure-JAX reference (mirrors the PyTorch module in eval mode) ----
def gvae_reference(ops, adj, params, dims, normalize=True):
    num_hidden = len(dims) - 2
    if normalize:
        colsum = adj.sum(axis=1)                      # (B, N) indexed by column
        rowsum = adj.sum(axis=2)                      # (B, N) indexed by row
        colsum = jnp.where(colsum == 0, 1e-10, colsum)
        rowsum = jnp.where(rowsum == 0, 1e-10, rowsum)
        adj = adj * (1.0 / jnp.sqrt(colsum))[:, :, None] \
                  * (1.0 / jnp.sqrt(rowsum))[:, None, :]

    def gc(x, w, b):
        support = jnp.einsum('bnf,of->bno', x, w)
        return jax.nn.relu(jnp.einsum('bnm,bmo->bno', adj, support)) + b[None]

    idx = 0
    x = ops
    for _ in range(num_hidden):
        x = gc(x, params[idx], params[idx + 1]); idx += 2
    mu = gc(x, params[idx], params[idx + 1]); idx += 2
    logvar = gc(x, params[idx], params[idx + 1]); idx += 2
    wdec, bdec = params[idx], params[idx + 1]
    z = mu
    ops_recon = jax.nn.sigmoid(jnp.einsum('bnz,oz->bno', z, wdec) + bdec[None])
    adj_recon = jax.nn.sigmoid(jnp.einsum('bnz,bmz->bnm', z, z))
    return ops_recon, adj_recon, mu, logvar


if __name__ == "__main__":
    dims = [16, 32, 16]     # dims[0]=input feature dim, dims[-1]=latent dim
    B, N = 30, 8            # B padded to 32 internally -> 2 grid steps of 16 graphs
    normalize = True

    key = jax.random.PRNGKey(0)
    k_ops, k_adj, k_par = jax.random.split(key, 3)

    ops = jax.random.uniform(k_ops, (B, N, dims[0]), jnp.float32)
    adj = jax.random.uniform(k_adj, (B, N, N), jnp.float32)

    params = init_gvae_params(k_par, dims)
    ref = gvae_reference(ops, adj, params, dims, normalize=normalize)

    # Full-precision (f32 MXU inputs) run — tight check against the reference.
    out_f32 = gvae_forward(ops, adj, params, dims, normalize=normalize,
                           compute_dtype=jnp.float32)
    out_f32 = jax.block_until_ready(out_f32)
    for o, r in zip(out_f32, ref):
        np.testing.assert_allclose(np.asarray(o), np.asarray(r),
                                   rtol=1e-2, atol=1e-2)

    # bf16 matmul inputs (f32 accumulation, default) — the fast MXU path; loose check.
    out_bf16 = gvae_forward(ops, adj, params, dims, normalize=normalize)
    out_bf16 = jax.block_until_ready(out_bf16)
    for o, r in zip(out_bf16, ref):
        np.testing.assert_allclose(np.asarray(o), np.asarray(r),
                                   rtol=1e-1, atol=1e-1)

    print("KERNEL_OK")
</pallas_src>

<mosaic_0001>
module attributes {stable_mosaic.version = 11 : i64} {
  func.func @kernel(%arg0: i32, %arg1: memref<8x128xf32, #tpu.memory_space<vmem>>, %arg2: memref<128x128xf32, #tpu.memory_space<vmem>>, %arg3: memref<128x16xf32, #tpu.memory_space<vmem>>, %arg4: memref<128x8xf32, #tpu.memory_space<vmem>>, %arg5: memref<16x32xf32, #tpu.memory_space<vmem>>, %arg6: memref<1x32xf32, #tpu.memory_space<vmem>>, %arg7: memref<32x32xf32, #tpu.memory_space<vmem>>, %arg8: memref<1x32xf32, #tpu.memory_space<vmem>>, %arg9: memref<16x16xf32, #tpu.memory_space<vmem>>, %arg10: memref<1x16xf32, #tpu.memory_space<vmem>>, %arg11: memref<128x48xf32, #tpu.memory_space<vmem>>, %arg12: memref<8x128xf32, #tpu.memory_space<vmem>>) attributes {dimension_semantics = [#tpu.dimension_semantics<parallel>], iteration_bounds = array<i64: 2>, scalar_prefetch = 0 : i64, scratch_operands = 0 : i64, tpu.core_type = #tpu.core_type<tc>, window_params = [{pipeline_mode = #tpu.pipeline_mode<synchronous>, transform_indices = @transform_0, window_bounds = array<i64: 8, 128>}, {pipeline_mode = #tpu.pipeline_mode<synchronous>, transform_indices = @transform_1, window_bounds = array<i64: 128, 128>}, {transform_indices = @transform_2, window_bounds = array<i64: 128, 16>}, {transform_indices = @transform_3, window_bounds = array<i64: 128, 8>}, {pipeline_mode = #tpu.pipeline_mode<synchronous>, transform_indices = @transform_4, window_bounds = array<i64: 16, 32>}, {pipeline_mode = #tpu.pipeline_mode<synchronous>, transform_indices = @transform_5, window_bounds = array<i64: 1, 32>}, {pipeline_mode = #tpu.pipeline_mode<synchronous>, transform_indices = @transform_6, window_bounds = array<i64: 32, 32>}, {pipeline_mode = #tpu.pipeline_mode<synchronous>, transform_indices = @transform_7, window_bounds = array<i64: 1, 32>}, {pipeline_mode = #tpu.pipeline_mode<synchronous>, transform_indices = @transform_8, window_bounds = array<i64: 16, 16>}, {pipeline_mode = #tpu.pipeline_mode<synchronous>, transform_indices = @transform_9, window_bounds = array<i64: 1, 16>}, {transform_indices = @transform_10, window_bounds = array<i64: 128, 48>}, {transform_indices = @transform_11, window_bounds = array<i64: 8, 128>}]} {
    %c0 = arith.constant 0 : index
    %c0_0 = arith.constant 0 : index
    %0 = vector.load %arg5[%c0, %c0_0] : memref<16x32xf32, #tpu.memory_space<vmem>>, vector<16x32xf32>
    %c0_1 = arith.constant 0 : index
    %c0_2 = arith.constant 0 : index
    %1 = vector.load %arg6[%c0_1, %c0_2] : memref<1x32xf32, #tpu.memory_space<vmem>>, vector<1x32xf32>
    %c0_3 = arith.constant 0 : index
    %c0_4 = arith.constant 0 : index
    %2 = vector.load %arg7[%c0_3, %c0_4] : memref<32x32xf32, #tpu.memory_space<vmem>>, vector<32x32xf32>
    %c0_5 = arith.constant 0 : index
    %c0_6 = arith.constant 0 : index
    %3 = vector.load %arg8[%c0_5, %c0_6] : memref<1x32xf32, #tpu.memory_space<vmem>>, vector<1x32xf32>
    %c0_7 = arith.constant 0 : index
    %c0_8 = arith.constant 0 : index
    %4 = vector.load %arg9[%c0_7, %c0_8] : memref<16x16xf32, #tpu.memory_space<vmem>>, vector<16x16xf32>
    %c0_9 = arith.constant 0 : index
    %c0_10 = arith.constant 0 : index
    %5 = vector.load %arg10[%c0_9, %c0_10] : memref<1x16xf32, #tpu.memory_space<vmem>>, vector<1x16xf32>
    %c0_11 = arith.constant 0 : index
    %c0_12 = arith.constant 0 : index
    %6 = vector.load %arg1[%c0_11, %c0_12] : memref<8x128xf32, #tpu.memory_space<vmem>>, vector<8x128xf32>
    %c0_13 = arith.constant 0 : index
    %c0_14 = arith.constant 0 : index
    %7 = vector.load %arg2[%c0_13, %c0_14] : memref<128x128xf32, #tpu.memory_space<vmem>>, vector<128x128xf32>
    %c0_15 = arith.constant 0 : index
    %c0_16 = arith.constant 0 : index
    %8 = vector.load %arg4[%c0_15, %c0_16] : memref<128x8xf32, #tpu.memory_space<vmem>>, vector<128x8xf32>
    %cst = arith.constant dense<0.000000e+00> : vector<128x128xf32>
    %9 = tpu.matmul %8, %6, %cst {dimension_numbers = #tpu.dot_dimension_numbers<[1], [0], [0], [1], [0, 0, 1, 1], [], []>} : vector<128x8xf32>, vector<8x128xf32>, vector<128x128xf32> -> vector<128x128xf32>
    %10 = arith.mulf %9, %7 : vector<128x128xf32>
    %cst_17 = arith.constant dense<0.000000e+00> : vector<128xf32>
    %11 = vector.multi_reduction <add>, %8, %cst_17 [1] : vector<128x8xf32> to vector<128xf32>
    %12 = vector.shape_cast %11 : vector<128xf32> to vector<128x1xf32>
    %cst_18 = arith.constant dense<0.000000e+00> : vector<128xf32>
    %13 = vector.multi_reduction <add>, %10, %cst_18 [0] : vector<128x128xf32> to vector<128xf32>
    %14 = vector.shape_cast %13 : vector<128xf32> to vector<1x128xf32>
    %cst_19 = arith.constant 0.000000e+00 : f32
    %15 = vector.broadcast %cst_19 : f32 to vector<128x1xf32>
    %16 = arith.cmpf oeq, %12, %15 : vector<128x1xf32>
    %cst_20 = arith.constant 1.000000e-10 : f32
    %17 = vector.broadcast %cst_20 : f32 to vector<128x1xf32>
    %18 = arith.select %16, %17, %12 : vector<128x1xi1>, vector<128x1xf32>
    %cst_21 = arith.constant 0.000000e+00 : f32
    %19 = vector.broadcast %cst_21 : f32 to vector<1x128xf32>
    %20 = arith.cmpf oeq, %14, %19 : vector<1x128xf32>
    %cst_22 = arith.constant 1.000000e-10 : f32
    %21 = vector.broadcast %cst_22 : f32 to vector<1x128xf32>
    %22 = arith.select %20, %21, %14 : vector<1x128xi1>, vector<1x128xf32>
    %23 = math.rsqrt %22 : vector<1x128xf32>
    %24 = tpu.transpose %23, [1, 0] : vector<1x128xf32> -> vector<128x1xf32>
    %25 = vector.broadcast %24 : vector<128x1xf32> to vector<128x128xf32>
    %26 = arith.mulf %10, %25 : vector<128x128xf32>
    %27 = math.rsqrt %18 : vector<128x1xf32>
    %28 = tpu.transpose %27, [1, 0] : vector<128x1xf32> -> vector<1x128xf32>
    %29 = vector.broadcast %28 : vector<1x128xf32> to vector<128x128xf32>
    %30 = arith.mulf %26, %29 : vector<128x128xf32>
    %c0_23 = arith.constant 0 : index
    %c0_24 = arith.constant 0 : index
    %31 = vector.load %arg3[%c0_23, %c0_24] : memref<128x16xf32, #tpu.memory_space<vmem>>, vector<128x16xf32>
    %cst_25 = arith.constant dense<0.000000e+00> : vector<128x32xf32>
    %32 = tpu.matmul %31, %0, %cst_25 {dimension_numbers = #tpu.dot_dimension_numbers<[1], [0], [0], [1], [0, 0, 1, 1], [], []>} : vector<128x16xf32>, vector<16x32xf32>, vector<128x32xf32> -> vector<128x32xf32>
    %cst_26 = arith.constant dense<0.000000e+00> : vector<128x32xf32>
    %33 = tpu.matmul %30, %32, %cst_26 {dimension_numbers = #tpu.dot_dimension_numbers<[1], [0], [0], [1], [0, 0, 1, 1], [], []>} : vector<128x128xf32>, vector<128x32xf32>, vector<128x32xf32> -> vector<128x32xf32>
    %cst_27 = arith.constant 0.000000e+00 : f32
    %34 = vector.broadcast %cst_27 : f32 to vector<128x32xf32>
    %35 = arith.maximumf %33, %34 : vector<128x32xf32>
    %36 = vector.broadcast %1 : vector<1x32xf32> to vector<128x32xf32>
    %37 = arith.addf %35, %36 : vector<128x32xf32>
    %cst_28 = arith.constant dense<0.000000e+00> : vector<128x32xf32>
    %38 = tpu.matmul %37, %2, %cst_28 {dimension_numbers = #tpu.dot_dimension_numbers<[1], [0], [0], [1], [0, 0, 1, 1], [], []>} : vector<128x32xf32>, vector<32x32xf32>, vector<128x32xf32> -> vector<128x32xf32>
    %cst_29 = arith.constant dense<0.000000e+00> : vector<128x32xf32>
    %39 = tpu.matmul %30, %38, %cst_29 {dimension_numbers = #tpu.dot_dimension_numbers<[1], [0], [0], [1], [0, 0, 1, 1], [], []>} : vector<128x128xf32>, vector<128x32xf32>, vector<128x32xf32> -> vector<128x32xf32>
    %cst_30 = arith.constant 0.000000e+00 : f32
    %40 = vector.broadcast %cst_30 : f32 to vector<128x32xf32>
    %41 = arith.maximumf %39, %40 : vector<128x32xf32>
    %42 = vector.broadcast %3 : vector<1x32xf32> to vector<128x32xf32>
    %43 = arith.addf %41, %42 : vector<128x32xf32>
    %44 = vector.extract_strided_slice %43 {offsets = [0, 0], sizes = [128, 16], strides = [1, 1]} : vector<128x32xf32> to vector<128x16xf32>
    %cst_31 = arith.constant dense<0.000000e+00> : vector<128x16xf32>
    %45 = tpu.matmul %44, %4, %cst_31 {dimension_numbers = #tpu.dot_dimension_numbers<[1], [0], [0], [1], [0, 0, 1, 1], [], []>} : vector<128x16xf32>, vector<16x16xf32>, vector<128x16xf32> -> vector<128x16xf32>
    %46 = vector.broadcast %5 : vector<1x16xf32> to vector<128x16xf32>
    %47 = arith.addf %45, %46 : vector<128x16xf32>
    %48 = arith.negf %47 : vector<128x16xf32>
    %49 = math.exp %48 : vector<128x16xf32>
    %cst_32 = arith.constant 1.000000e+00 : f32
    %50 = vector.broadcast %cst_32 : f32 to vector<128x16xf32>
    %51 = arith.addf %50, %49 : vector<128x16xf32>
    %52 = arith.divf %50, %51 : vector<128x16xf32>
    %53 = tpu.concatenate %43, %52 in 1 : vector<128x32xf32>, vector<128x16xf32> -> vector<128x48xf32>
    %c0_33 = arith.constant 0 : index
    %c0_34 = arith.constant 0 : index
    %54 = vector.load %arg11[%c0_33, %c0_34] : memref<128x48xf32, #tpu.memory_space<vmem>>, vector<128x48xf32>
    tpu.vector_store %arg11[%c0_33, %c0_34], %53 {strides = array<i32>} : memref<128x48xf32, #tpu.memory_space<vmem>>, vector<128x48xf32>,
    "tpu.trace_start"() <{level = 10 : i32, message = "nd,md->nm"}> : () -> ()
    %cst_35 = arith.constant dense<0.000000e+00> : vector<128x128xf32>
    %55 = tpu.matmul %44, %44, %cst_35 {dimension_numbers = #tpu.dot_dimension_numbers<[1], [1], [0], [0], [0, 0, 1, 0], [], []>} : vector<128x16xf32>, vector<128x16xf32>, vector<128x128xf32> -> vector<128x128xf32>
    "tpu.trace_stop"() : () -> ()
    %56 = arith.mulf %55, %7 : vector<128x128xf32>
    %cst_36 = arith.constant dense<0.000000e+00> : vector<8x128xf32>
    %57 = tpu.matmul %6, %56, %cst_36 {dimension_numbers = #tpu.dot_dimension_numbers<[1], [0], [0], [1], [0, 0, 1, 1], [], []>} : vector<8x128xf32>, vector<128x128xf32>, vector<8x128xf32> -> vector<8x128xf32>
    %58 = arith.negf %57 : vector<8x128xf32>
    %59 = math.exp %58 : vector<8x128xf32>
    %cst_37 = arith.constant 1.000000e+00 : f32
    %60 = vector.broadcast %cst_37 : f32 to vector<8x128xf32>
    %61 = arith.addf %60, %59 : vector<8x128xf32>
    %62 = arith.divf %60, %61 : vector<8x128xf32>
    %c0_38 = arith.constant 0 : index
    %c0_39 = arith.constant 0 : index
    %63 = vector.load %arg12[%c0_38, %c0_39] : memref<8x128xf32, #tpu.memory_space<vmem>>, vector<8x128xf32>
    tpu.vector_store %arg12[%c0_38, %c0_39], %62 {strides = array<i32>} : memref<8x128xf32, #tpu.memory_space<vmem>>, vector<8x128xf32>,
    return
  }
  func.func @transform_0(%arg0: i32) -> (i32, i32) {
    %c0_i32 = arith.constant 0 : i32
    %c0_i32_0 = arith.constant 0 : i32
    %c0_i32_1 = arith.constant 0 : i32
    return %c0_i32, %c0_i32_0 : i32, i32
  }
  func.func @transform_1(%arg0: i32) -> (i32, i32) {
    %c0_i32 = arith.constant 0 : i32
    %c0_i32_0 = arith.constant 0 : i32
    %c0_i32_1 = arith.constant 0 : i32
    return %c0_i32, %c0_i32_0 : i32, i32
  }
  func.func @transform_2(%arg0: i32) -> (i32, i32) {
    %c0_i32 = arith.constant 0 : i32
    %c0_i32_0 = arith.constant 0 : i32
    return %arg0, %c0_i32 : i32, i32
  }
  func.func @transform_3(%arg0: i32) -> (i32, i32) {
    %c0_i32 = arith.constant 0 : i32
    %c0_i32_0 = arith.constant 0 : i32
    return %arg0, %c0_i32 : i32, i32
  }
  func.func @transform_4(%arg0: i32) -> (i32, i32) {
    %c0_i32 = arith.constant 0 : i32
    %c0_i32_0 = arith.constant 0 : i32
    %c0_i32_1 = arith.constant 0 : i32
    return %c0_i32, %c0_i32_0 : i32, i32
  }
  func.func @transform_5(%arg0: i32) -> (i32, i32) {
    %c0_i32 = arith.constant 0 : i32
    %c0_i32_0 = arith.constant 0 : i32
    %c0_i32_1 = arith.constant 0 : i32
    return %c0_i32, %c0_i32_0 : i32, i32
  }
  func.func @transform_6(%arg0: i32) -> (i32, i32) {
    %c0_i32 = arith.constant 0 : i32
    %c0_i32_0 = arith.constant 0 : i32
    %c0_i32_1 = arith.constant 0 : i32
    return %c0_i32, %c0_i32_0 : i32, i32
  }
  func.func @transform_7(%arg0: i32) -> (i32, i32) {
    %c0_i32 = arith.constant 0 : i32
    %c0_i32_0 = arith.constant 0 : i32
    %c0_i32_1 = arith.constant 0 : i32
    return %c0_i32, %c0_i32_0 : i32, i32
  }
  func.func @transform_8(%arg0: i32) -> (i32, i32) {
    %c0_i32 = arith.constant 0 : i32
    %c0_i32_0 = arith.constant 0 : i32
    %c0_i32_1 = arith.constant 0 : i32
    return %c0_i32, %c0_i32_0 : i32, i32
  }
  func.func @transform_9(%arg0: i32) -> (i32, i32) {
    %c0_i32 = arith.constant 0 : i32
    %c0_i32_0 = arith.constant 0 : i32
    %c0_i32_1 = arith.constant 0 : i32
    return %c0_i32, %c0_i32_0 : i32, i32
  }
  func.func @transform_10(%arg0: i32) -> (i32, i32) {
    %c0_i32 = arith.constant 0 : i32
    %c0_i32_0 = arith.constant 0 : i32
    return %arg0, %c0_i32 : i32, i32
  }
  func.func @transform_11(%arg0: i32) -> (i32, i32) {
    %c0_i32 = arith.constant 0 : i32
    %c0_i32_0 = arith.constant 0 : i32
    return %arg0, %c0_i32 : i32, i32
  }
}

</mosaic_0001>

<bundles_post_ra>
// kernel: tpu_custom_call.1
= control target key start
LH: loop header
LB: loop body
LE: loop exit
PB: predicated region body
PF: predicated region fallthrough
CT: control target
= control target key end

     0   :  { %s4215_s0 = inlined_call_operand.vmem [shape: f32[8,128], index: 0, kind: input, shape index: {}]   ;;  %s4216_s1 = inlined_call_operand.vmem [shape: f32[128,128], index: 1, kind: input, shape index: {}]   ;;  %s4217_s2 = inlined_call_operand.vmem [shape: f32[256,16], index: 2, kind: input, shape index: {}]   ;;  %s4218_s3 = inlined_call_operand.vmem [shape: f32[256,8], index: 3, kind: input, shape index: {}]   ;;  %s4219_s4 = inlined_call_operand.vmem [shape: f32[16,32], index: 4, kind: input, shape index: {}]   ;;  %s4220_s5 = inlined_call_operand.vmem [shape: f32[1,32], index: 5, kind: input, shape index: {}]   ;;  %s4221_s6 = inlined_call_operand.vmem [shape: f32[32,32], index: 6, kind: input, shape index: {}]   ;;  %s4222_s7 = inlined_call_operand.vmem [shape: f32[1,32], index: 7, kind: input, shape index: {}]   ;;  %s4223_s8 = inlined_call_operand.vmem [shape: f32[16,16], index: 8, kind: input, shape index: {}]   ;;  %s4224_s9 = inlined_call_operand.vmem [shape: f32[1,16], index: 9, kind: input, shape index: {}]   ;;  %s4225_s10 = inlined_call_operand.vmem [shape: f32[256,48], index: 10, kind: output, shape index: {0}]   ;;  %s4226_s11 = inlined_call_operand.hbm [shape: f32[16,128], index: 11, kind: output, shape index: {1}]  }
   0x1   :  { %4227 = sst [smem:[#allocation5_spill]] %s4215_s0 }
   0x2   :  { %4228 = sst [smem:[#allocation6_spill]] %s4216_s1 }
   0x3   :  { %17 = vsyncpa [#allocation3], 0 }
   0x4   :  { %19 = vsyncpa [#allocation3 + $0x1], 0  ;;  %s3421_s17 = smov 0   ;;  %s3423_s18 = smov 0  }
   0x5   :  { %s3425_s19 = smov 0   ;;  %s3427_s20 = smov 0  }
   0x6 LB: > { %s3442_s21 = sadd.s32 4294967295, %s3354_s20   ;;  %s2496_s22 = sadd.s32 4294967294, %s3354_s20   ;;  %s3354_s20 = sphi %s3427_s20, %s4236_s20   ;;  %s3350_s19 = sphi %s3425_s19, %s4235_s19   ;;  %s3346_s18 = sphi %s3423_s18, %s4234_s18   ;;  %s3342_s17 = sphi %s3421_s17, %s4233_s17  }
   0x7   : > { %s3446_s23 = sadd.s32 1, %s3354_s20   ;;  %s278_s24 = sadd.s32 1, %s3350_s19 }
   0x8   : > { %s275_s25 = ssub.s32 %s3354_s20, %s3446_s23  ;;  %p288_p0 = scmp.ne.s32.totalorder %s3350_s19, %s3346_s18 }
   0x9   : > { %p276_p1 = scmp.eq.s32.totalorder %s275_s25, 0  ;;  %p289_p2 = scmp.eq.s32.totalorder %s3442_s21, 1 }
   0xa   : > { %p294_p3 = scmp.ne.s32.totalorder %s3346_s18, %s3342_s17  ;;  %p295_p4 = scmp.eq.s32.totalorder %s2496_s22, 1 }
   0xb   : > { %s3457_s26 = scalar_select %p276_p1, %s3350_s19, %s278_s24  }
   0xc   : > { %p3459_p5 = por %p289_p2, %p288_p0  ;;  %p3463_p6 = por %p295_p4, %p294_p3 }
   0xd   : > { %p2499_p7 = scmp.ge.s32.totalorder %s3354_s20, 1  ;;  %p355_p8 = scmp.lt.s32.totalorder %s3354_s20, 3 }
   0xf   : > { %p356_p9 = pnand %p2499_p7, %p355_p8 }
  0x10   : > { %s4231_s0 = sld [smem:[#allocation5_spill]] (!%p356_p9)  ;;  %s2501_s12 = sshll.u32 (!%p356_p9), %s3442_s21, 4 }
  0x11   : > { %359 = sbr.rel (%p356_p9) target bundleno = 1874 (0x752), region = 60  ;;  %p406_p10 = scmp.lt.s32.totalorder (!%p356_p9), %s2501_s12, 31 }
  0x12   : > { %s4232_s1 = sld [smem:[#allocation6_spill]] (!%p356_p9)  ;;  %s3359_s29 = smov (!%p356_p9), 32  }
  0x16   : > { %v434_v0 = vld [vmem:[%s4231_s0] sm:$0xff]  ;;  %s4238_s12 = smov (!%p406_p10, %s2501_s12), 31  ;;  %vm467_vm0 = vcmask 64512   ;;  %v424_v25 = vld [vmem:[%s4219_s4 + $0x8] sm:$0xff]  ;;  %vm993_vm1 = vcmask 130048   ;;  %v3356_v32 = vmov 0  }
  0x17   : > { %2813 = vmatprep.subr.mxu0 %v434_v0  ;;  %s3473_s13 = sshll.u32 %s4238_s12, 3  ;;  %v423_v26 = vld [vmem:[%s4219_s4] sm:$0xff]  ;;  %2839 = vmatprep.subr.mxu1 %v424_v25 }
  0x18   : > { %2814 = vmatpush3.msra.mxu0 %v434_v0  ;;  %s3479_s16 = scalar_lea.vmem %s4218_s3, %s3473_s13  ;;  %s3534_s14 = scalar_lea.vmem %s4217_s2, %s3473_s13  ;;  %2840 = vmatpush3.msra.mxu1 %v424_v25  ;;  %v435_v53 = vld [vmem:[%s4232_s1] sm:$0xff]  ;;  %v436_v54 = vld [vmem:[%s4232_s1 + $0x8] sm:$0xff]  ;;  %v437_v58 = vld [vmem:[%s4232_s1 + $0x10] sm:$0xff] }
  0x19   : > { %v451_v1 = vld [vmem:[%s3479_s16] sm:$0xff]  ;;  %v452_v2 = vld [vmem:[%s3479_s16 + $0x8] sm:$0xff]  ;;  %v453_v3 = vld [vmem:[%s3479_s16 + $0x10] sm:$0xff]  ;;  %2841 = vmatprep.subr.mxu1 %v423_v26  ;;  %3173 = vset.pattern.permute.xlu1 %v3356_v32  ;;  %s4105_s25 = scalar_lea.vmem %s4225_s10, %s3473_s13  ;;  %s402_s13 = sand.u32 1, %s3346_s18  }
  0x1a   : > { %2815 = vmatprep.mubr.msk.f32.mxu0 %vm467_vm0, %v451_v1  ;;  %v677_v4 = vsel %vm467_vm0, %v451_v1, 0.0  ;;  %v454_v5 = vld [vmem:[%s3479_s16 + $0x18] sm:$0xff]  ;;  %v680_v6 = vsel %vm467_vm0, %v452_v2, 0.0  ;;  %v455_v7 = vld [vmem:[%s3479_s16 + $0x20] sm:$0xff]  ;;  %v456_v8 = vld [vmem:[%s3479_s16 + $0x28] sm:$0xff]  ;;  %v683_v27 = vsel %vm467_vm0, %v453_v3, 0.0  ;;  %2842 = vmatpush3.msra.mxu1 %v423_v26 }
  0x1b   : > { %2816 = vmatmul.mubr.msk.f32.vlgmr.msra.gmra.mxu0 %vm467_vm0, %v452_v2  ;;  %678 = vadd.xlane.f32.xlu0 %v677_v4  ;;  %v689_v9 = vsel %vm467_vm0, %v455_v7, 0.0  ;;  %v457_v10 = vld [vmem:[%s3479_s16 + $0x30] sm:$0xff]  ;;  %v458_v11 = vld [vmem:[%s3479_s16 + $0x38] sm:$0xff]  ;;  %v459_v12 = vld [vmem:[%s3479_s16 + $0x40] sm:$0xff]  ;;  %v686_v30 = vsel %vm467_vm0, %v454_v5, 0.0  ;;  %v692_v34 = vsel %vm467_vm0, %v456_v8, 0.0 }
  0x1c   : > { %2818 = vmatprep.mubr.msk.f32.mxu0 %vm467_vm0, %v453_v3  ;;  %v460_v13 = vld [vmem:[%s3479_s16 + $0x48] sm:$0xff]  ;;  %v461_v14 = vld [vmem:[%s3479_s16 + $0x50] sm:$0xff]  ;;  %v462_v15 = vld [vmem:[%s3479_s16 + $0x58] sm:$0xff]  ;;  %v695_v20 = vsel %vm467_vm0, %v457_v10, 0.0  ;;  %v701_v21 = vsel %vm467_vm0, %v459_v12, 0.0  ;;  %684 = vadd.xlane.f32.xlu1 %v683_v27  ;;  %v698_v37 = vsel %vm467_vm0, %v458_v11, 0.0 }
  0x1d   : > { %v463_v16 = vld [vmem:[%s3479_s16 + $0x60] sm:$0xff]  ;;  %v464_v17 = vld [vmem:[%s3479_s16 + $0x68] sm:$0xff]  ;;  %v465_v18 = vld [vmem:[%s3479_s16 + $0x70] sm:$0xff]  ;;  %v707_v22 = vsel %vm467_vm0, %v461_v14, 0.0  ;;  %v704_v40 = vsel %vm467_vm0, %v460_v13, 0.0  ;;  %v710_v43 = vsel %vm467_vm0, %v462_v15, 0.0 }
  0x1e   : > { %v3515_v19 = vld [vmem:[%s3479_s16 + $0x78] sm:$0xff]  ;;  %v713_v23 = vsel %vm467_vm0, %v463_v16, 0.0  ;;  %v719_v24 = vsel %vm467_vm0, %v465_v18, 0.0  ;;  %v977_v28 = vld [vmem:[%s3534_s14] sm:$0xff]  ;;  %v978_v29 = vld [vmem:[%s3534_s14 + $0x8] sm:$0xff]  ;;  %v716_v46 = vsel %vm467_vm0, %v464_v17, 0.0 }
  0x1f   : > { %2819 = vmatmul.mubr.msk.f32.gmra.mxu0 %vm467_vm0, %v454_v5  ;;  %681 = vadd.xlane.f32.xlu0 %v680_v6  ;;  %v979_v31 = vld [vmem:[%s3534_s14 + $0x10] sm:$0xff]  ;;  %v980_v33 = vld [vmem:[%s3534_s14 + $0x18] sm:$0xff]  ;;  %v981_v35 = vld [vmem:[%s3534_s14 + $0x20] sm:$0xff]  ;;  %v722_v49 = vsel %vm467_vm0, %v3515_v19, 0.0  ;;  %s2500_s12 = sshll.u32 %s402_s13, 3 }
  0x20   : > { %2821 = vmatprep.mubr.msk.f32.mxu0 %vm467_vm0, %v455_v7  ;;  %2843 = vmatprep.mubr.msk.f32.mxu1 %vm993_vm1, %v977_v28  ;;  %v982_v36 = vld [vmem:[%s3534_s14 + $0x28] sm:$0xff]  ;;  %v983_v38 = vld [vmem:[%s3534_s14 + $0x30] sm:$0xff]  ;;  %v984_v39 = vld [vmem:[%s3534_s14 + $0x38] sm:$0xff]  ;;  %s404_s15 = scalar_lea.vmem [#allocation2], %s2500_s12 }
  0x21   : > { %2844 = vmatmul.mubr.msk.f32.vlgmr.msra.gmra.mxu1 %vm993_vm1, %v978_v29  ;;  %687 = vadd.xlane.f32.xlu1 %v686_v30  ;;  %v985_v41 = vld [vmem:[%s3534_s14 + $0x40] sm:$0xff]  ;;  %v986_v42 = vld [vmem:[%s3534_s14 + $0x48] sm:$0xff]  ;;  %v987_v44 = vld [vmem:[%s3534_s14 + $0x50] sm:$0xff]  ;;  %s2400_s16 = sshll.u32 %s404_s15, 4  ;;  %s2401_s16 = int_to_ptr.vmem [resolvable:$true] %s2400_s16 }
  0x22   : > { %2846 = vmatprep.mubr.msk.f32.mxu1 %vm993_vm1, %v979_v31  ;;  %v988_v45 = vld [vmem:[%s3534_s14 + $0x58] sm:$0xff]  ;;  %v989_v47 = vld [vmem:[%s3534_s14 + $0x60] sm:$0xff]  ;;  %v990_v48 = vld [vmem:[%s3534_s14 + $0x68] sm:$0xff]  ;;  %s3294_s30 = scalar_lea.vmem %s2401_s16, 128 }
  0x23   : > { %2822 = vmatmul.mubr.msk.f32.gmra.mxu0 %vm467_vm0, %v456_v8  ;;  %690 = vadd.xlane.f32.xlu0 %v689_v9  ;;  %v991_v50 = vld [vmem:[%s3534_s14 + $0x70] sm:$0xff]  ;;  %v992_v51 = vld [vmem:[%s3534_s14 + $0x78] sm:$0xff]  ;;  %v439_v1 = vld [vmem:[%s4232_s1 + $0x20] sm:$0xff]  ;;  %s2624_s14 = sshll.u32 %s3442_s21, 7  ;;  %p3295_p11 = scmp.ne.s32.totalorder %s2401_s16, %s3294_s30 }
  0x24   : > { %2824 = vmatprep.mubr.msk.f32.mxu0 %vm467_vm0, %v457_v10  ;;  %v438_v60 = vld [vmem:[%s4232_s1 + $0x18] sm:$0xff]  ;;  %v440_v4 = vld [vmem:[%s4232_s1 + $0x28] sm:$0xff]  ;;  %v441_v9 = vld [vmem:[%s4232_s1 + $0x30] sm:$0xff] }
  0x25   : > { %2847 = vmatmul.mubr.msk.f32.gmra.mxu1 %vm993_vm1, %v980_v33  ;;  %693 = vadd.xlane.f32.xlu1 %v692_v34  ;;  %v445_v25 = vld [vmem:[%s4232_s1 + $0x50] sm:$0xff]  ;;  %v446_v28 = vld [vmem:[%s4232_s1 + $0x58] sm:$0xff]  ;;  %v447_v34 = vld [vmem:[%s4232_s1 + $0x60] sm:$0xff]  ;;  %p3296_p12 = pnand %p3295_p11, %p3459_p5 }
  0x26   : > { %2849 = vmatprep.mubr.msk.f32.mxu1 %vm993_vm1, %v981_v35 }
  0x27   : > { %2825 = vmatmul.mubr.msk.f32.gmra.mxu0 %vm467_vm0, %v458_v11  ;;  %696 = vadd.xlane.f32.xlu0 %v695_v20  ;;  %v444_v20 = vld [vmem:[%s4232_s1 + $0x48] sm:$0xff]  ;;  %p3297_p13 = pneg %p3296_p12 }
  0x28   : > { %2827 = vmatprep.mubr.msk.f32.mxu0 %vm467_vm0, %v459_v12  ;;  %v442_v12 = vld [vmem:[%s4232_s1 + $0x38] sm:$0xff] }
  0x29   : > { %2850 = vmatmul.mubr.msk.f32.gmra.mxu1 %vm993_vm1, %v982_v36  ;;  %699 = vadd.xlane.f32.xlu1 %v698_v37  ;;  %v448_v37 = vld [vmem:[%s4232_s1 + $0x68] sm:$0xff] }
  0x2a   : > { %2852 = vmatprep.mubr.msk.f32.mxu1 %vm993_vm1, %v983_v38 }
  0x2b   : > { %2828 = vmatmul.mubr.msk.f32.gmra.mxu0 %vm467_vm0, %v460_v13  ;;  %702 = vadd.xlane.f32.xlu0 %v701_v21 }
  0x2c   : > { %2830 = vmatprep.mubr.msk.f32.mxu0 %vm467_vm0, %v461_v14 }
  0x2d   : > { %2853 = vmatmul.mubr.msk.f32.gmra.mxu1 %vm993_vm1, %v984_v39  ;;  %705 = vadd.xlane.f32.xlu1 %v704_v40 }
  0x2e   : > { %2855 = vmatprep.mubr.msk.f32.mxu1 %vm993_vm1, %v985_v41 }
  0x2f   : > { %2831 = vmatmul.mubr.msk.f32.gmra.mxu0 %vm467_vm0, %v462_v15  ;;  %708 = vadd.xlane.f32.xlu0 %v707_v22 }
  0x30   : > { %2833 = vmatprep.mubr.msk.f32.mxu0 %vm467_vm0, %v463_v16 }
  0x31   : > { %2856 = vmatmul.mubr.msk.f32.gmra.mxu1 %vm993_vm1, %v986_v42  ;;  %711 = vadd.xlane.f32.xlu1 %v710_v43  ;;  %v449_v42 = vld [vmem:[%s4232_s1 + $0x70] sm:$0xff] }
  0x32   : > { %2858 = vmatprep.mubr.msk.f32.mxu1 %vm993_vm1, %v987_v44 }
  0x33   : > { %2834 = vmatmul.mubr.msk.f32.gmra.mxu0 %vm467_vm0, %v464_v17  ;;  %714 = vadd.xlane.f32.xlu0 %v713_v23  ;;  %v443_v17 = vld [vmem:[%s4232_s1 + $0x40] sm:$0xff] }
  0x34   : > { %2836 = vmatprep.mubr.msk.f32.mxu0 %vm467_vm0, %v465_v18 }
  0x35   : > { %2859 = vmatmul.mubr.msk.f32.gmra.mxu1 %vm993_vm1, %v988_v45  ;;  %717 = vadd.xlane.f32.xlu1 %v716_v46  ;;  %v450_v45 = vld [vmem:[%s4232_s1 + $0x78] sm:$0xff] }
  0x36   : > { %2861 = vmatprep.mubr.msk.f32.mxu1 %vm993_vm1, %v989_v47 }
  0x37   : > { %2837 = vmatmul.mubr.msk.f32.gmra.mxu0 %vm467_vm0, %v3515_v19  ;;  %720 = vadd.xlane.f32.xlu0 %v719_v24 }
  0x39   : > { %2862 = vmatmul.mubr.msk.f32.gmra.mxu1 %vm993_vm1, %v990_v48  ;;  %723 = vadd.xlane.f32.xlu1 %v722_v49 }
  0x3a   : > { %2864 = vmatprep.mubr.msk.f32.mxu1 %vm993_vm1, %v991_v50 }
  0x3d   : > { %2865 = vmatmul.mubr.msk.f32.gmra.mxu1 %vm993_vm1, %v992_v51 }
  0xdb   : > { %v2817_v52 = vpop.f32.mrf.mxu0 }
  0xdc   : > { %v3589_v59 = vmul.f32 %v2817_v52, %v436_v54 }
  0xdd   : > { %v582_v55 = vpop.f32.mrf.mxu0 }
  0xde   : > { %v3584_v56 = vmul.f32 %v582_v55, %v435_v53 }
  0xdf   : > { %v2820_v57 = vpop.f32.mrf.mxu0 }
  0xe0   : > { %v725_v62 = vadd.f32 %v3589_v59, %v3584_v56  ;;  %v3601_v2 = vmul.f32 %v2820_v57, %v438_v60 }
  0xe1   : > { %v592_v61 = vpop.f32.mrf.mxu0 }
  0xe2   : > { %v3596_v63 = vmul.f32 %v592_v61, %v437_v58 }
  0xe3   : > { %v2823_v0 = vpop.f32.mrf.mxu0 }
  0xe4   : > { %v726_v3 = vadd.f32 %v725_v62, %v3596_v63  ;;  %v3613_v10 = vmul.f32 %v2823_v0, %v440_v4  ;;  %v3675_v62 = vpop.xlane.xlu0 %678 }
  0xe5   : > { %v602_v5 = vpop.f32.mrf.mxu0  ;;  %vm746_vm3 = vcmp.eq.f32.partialorder %v3675_v62, 0.0 }
  0xe6   : > { %v3607_v6 = vmul.f32 %v602_v5, %v439_v1  ;;  %v727_v7 = vadd.f32 %v726_v3, %v3601_v2  ;;  %v3685_v5 = vpop.f32.mrf.mxu1 }
  0xe7   : > { %v2826_v8 = vpop.f32.mrf.mxu0 }
  0xe8   : > { %v728_v11 = vadd.f32 %v727_v7, %v3607_v6  ;;  %v3625_v18 = vmul.f32 %v2826_v8, %v442_v12  ;;  %v3677_v0 = vpop.xlane.xlu0 %681  ;;  %v3689_v8 = vpop.f32.mrf.mxu1 }
  0xe9   : > { %v612_v13 = vpop.f32.mrf.mxu0  ;;  %vm747_vm4 = vcmp.eq.f32.partialorder %v3677_v0, 0.0 }
  0xea   : > { %v3619_v14 = vmul.f32 %v612_v13, %v441_v9  ;;  %v729_v15 = vadd.f32 %v728_v11, %v3613_v10  ;;  %v2848_v9 = vpop.f32.mrf.mxu1 }
  0xeb   : > { %v2829_v16 = vpop.f32.mrf.mxu0 }
  0xec   : > { %v730_v19 = vadd.f32 %v729_v15, %v3619_v14  ;;  %v3637_v26 = vmul.f32 %v2829_v16, %v444_v20  ;;  %v3679_v1 = vpop.xlane.xlu0 %690 }
  0xed   : > { %v622_v21 = vpop.f32.mrf.mxu0  ;;  %vm750_vm7 = vcmp.eq.f32.partialorder %v3679_v1, 0.0 }
  0xee   : > { %v3631_v22 = vmul.f32 %v622_v21, %v443_v17  ;;  %v731_v23 = vadd.f32 %v730_v19, %v3625_v18 }
  0xef   : > { %v2832_v24 = vpop.f32.mrf.mxu0 }
  0xf0   : > { %v732_v27 = vadd.f32 %v731_v23, %v3631_v22  ;;  %v3649_v35 = vmul.f32 %v2832_v24, %v446_v28  ;;  %v3681_v3 = vpop.xlane.xlu0 %696 }
  0xf1   : > { %v632_v29 = vpop.f32.mrf.mxu0  ;;  %vm752_vm9 = vcmp.eq.f32.partialorder %v3681_v3, 0.0 }
  0xf2   : > { %v3643_v30 = vmul.f32 %v632_v29, %v445_v25  ;;  %v733_v31 = vadd.f32 %v732_v27, %v3637_v26 }
  0xf3   : > { %v2835_v33 = vpop.f32.mrf.mxu0 }
  0xf4   : > { %v734_v36 = vadd.f32 %v733_v31, %v3643_v30  ;;  %v3661_v43 = vmul.f32 %v2835_v33, %v448_v37  ;;  %v3683_v4 = vpop.xlane.xlu0 %702 }
  0xf5   : > { %v642_v38 = vpop.f32.mrf.mxu0  ;;  %vm754_vm11 = vcmp.eq.f32.partialorder %v3683_v4, 0.0 }
  0xf6   : > { %v3655_v39 = vmul.f32 %v642_v38, %v447_v34  ;;  %v735_v40 = vadd.f32 %v734_v36, %v3649_v35 }
  0xf7   : > { %v2838_v41 = vpop.f32.mrf.mxu0 }
  0xf8   : > { %v736_v44 = vadd.f32 %v735_v40, %v3655_v39  ;;  %v3670_v49 = vmul.f32 %v2838_v41, %v450_v45  ;;  %v3687_v7 = vpop.xlane.xlu0 %708 }
  0xf9   : > { %v652_v46 = vpop.f32.mrf.mxu0  ;;  %vm756_vm13 = vcmp.eq.f32.partialorder %v3687_v7, 0.0 }
  0xfa   : > { %v3667_v47 = vmul.f32 %v652_v46, %v449_v42  ;;  %v737_v48 = vadd.f32 %v736_v44, %v3661_v43 }
  0xfc   : > { %v738_v50 = vadd.f32 %v737_v48, %v3667_v47  ;;  %v3691_v11 = vpop.xlane.xlu0 %714 }
  0xfd   : > { %vm758_vm15 = vcmp.eq.f32.partialorder %v3691_v11, 0.0 }
  0xfe   : > { %v739_v51 = vadd.f32 %v738_v50, %v3670_v49 }
 0x100   : > { %v740_v52 = vrot.slane %v739_v51, 4  ;;  %v3693_v15 = vpop.xlane.xlu0 %720 }
 0x102   : > { %v741_v53 = vadd.f32 %v740_v52, %v739_v51  ;;  %v685_v52 = vpop.xlane.xlu1 %684 }
 0x103   : > { %vm748_vm5 = vcmp.eq.f32.partialorder %v685_v52, 0.0 }
 0x104   : > { %v742_v54 = vrot.slane %v741_v53, 2 }
 0x106   : > { %v743_v55 = vadd.f32 %v742_v54, %v741_v53  ;;  %v762_v53 = vsel %vm746_vm3, 1e-10, %v3675_v62  ;;  %v763_v54 = vsel %vm747_vm4, 1e-10, %v3677_v0  ;;  %v766_v62 = vsel %vm750_vm7, 1e-10, %v3679_v1 }
 0x107   : > { %vm1370_vm4 = vcmask 261120  }
 0x108   : > { %v744_v57 = vrot.slane %v743_v55, 1 }
 0x10a   : > { %v745_v58 = vadd.f32 %v744_v57, %v743_v55  ;;  %v688_v55 = vpop.xlane.xlu1 %687  ;;  %v764_v57 = vsel %vm748_vm5, 1e-10, %v685_v52  ;;  %vm2122_vm5 = vcmask 392192  }
 0x10b   : > { %vm749_vm6 = vcmp.eq.f32.partialorder %v688_v55, 0.0 }
 0x10c   : > { %vm778_vm2 = vcmp.eq.f32.partialorder %v745_v58, 0.0 }
 0x10d   : > { %v779_v60 = vsel %vm778_vm2, 1e-10, %v745_v58  ;;  %v765_v58 = vsel %vm749_vm6, 1e-10, %v688_v55  ;;  %vm760_vm2 = vcmp.eq.f32.partialorder %v3693_v15, 0.0 }
 0x10e   : > { %3175 = vrsqrt.f32 %v779_v60  ;;  %v694_v60 = vpop.xlane.xlu1 %693 }
 0x10f   : > { %3177 = vrsqrt.f32 %v762_v53  ;;  %vm751_vm8 = vcmp.eq.f32.partialorder %v694_v60, 0.0 }
 0x110   : > { %3179 = vrsqrt.f32 %v763_v54 }
 0x111   : > { %3181 = vrsqrt.f32 %v764_v57 }
 0x112   : > { %3183 = vrsqrt.f32 %v765_v58 }
 0x113   : > { %3185 = vrsqrt.f32 %v766_v62 }
 0x11b   : > { %v3176_v61 = vpop.eup %3175 }
 0x11c   : > { %781 = vxpose.xlu0.b32.start.end [1/1] (short) %v3176_v61, 128  ;;  %v3178_v61 = vpop.eup %3177 }
 0x145   : > { %3174 = vset.pattern.permute.xlu0 %v3356_v32  ;;  %v1118_v32 = vpop.f32.mrf.mxu1 }
 0x147   : > { %v2851_v12 = vpop.f32.mrf.mxu1 }
 0x149   : > { %v1128_v13 = vpop.f32.mrf.mxu1 }
 0x14b   : > { %v2854_v16 = vpop.f32.mrf.mxu1 }
 0x14d   : > { %v1138_v17 = vpop.f32.mrf.mxu1 }
 0x14f   : > { %v2857_v20 = vpop.f32.mrf.mxu1 }
 0x151   : > { %v1148_v21 = vpop.f32.mrf.mxu1 }
 0x153   : > { %v2860_v24 = vpop.f32.mrf.mxu1 }
 0x155   : > { %v1158_v25 = vpop.f32.mrf.mxu1 }
 0x157   : > { %v2863_v28 = vpop.f32.mrf.mxu1 }
 0x159   : > { %v1168_v29 = vpop.f32.mrf.mxu1 }
 0x15b   : > { %v2866_v33 = vpop.f32.mrf.mxu1 }
 0x15c   : > { %2867 = vmatprep.subr.mxu1 %v2866_v33 }
 0x15d   : > { %v1178_v34 = vpop.f32.mrf.mxu1  ;;  %2868 = vmatpush3.msra.mxu1 %v2866_v33 }
 0x15e   : > { %2869 = vmatprep.subr.mxu1 %v1178_v34 }
 0x15f   : > { %2870 = vmatpush3.msra.mxu1 %v1178_v34 }
 0x160   : > { %2871 = vmatprep.subr.mxu1 %v2863_v28 }
 0x161   : > { %2872 = vmatpush3.msra.mxu1 %v2863_v28 }
 0x162   : > { %2873 = vmatprep.subr.mxu1 %v1168_v29 }
 0x163   : > { %2874 = vmatpush3.msra.mxu1 %v1168_v29  ;;  %v774_v29 = vsel %vm758_vm15, 1e-10, %v3691_v11 }
 0x164   : > { %2875 = vmatprep.subr.mxu1 %v2860_v24 }
 0x165   : > { %2876 = vmatpush3.msra.mxu1 %v2860_v24 }
 0x166   : > { %2877 = vmatprep.subr.mxu1 %v1158_v25 }
 0x167   : > { %2878 = vmatpush3.msra.mxu1 %v1158_v25 }
 0x168   : > { %2879 = vmatprep.subr.mxu1 %v2857_v20 }
 0x169   : > { %2880 = vmatpush3.msra.mxu1 %v2857_v20 }
 0x16a   : > { %2881 = vmatprep.subr.mxu1 %v1148_v21 }
 0x16b   : > { %2882 = vmatpush3.msra.mxu1 %v1148_v21 }
 0x16c   : > { %2883 = vmatprep.subr.mxu1 %v2854_v16 }
 0x16d   : > { %2884 = vmatpush3.msra.mxu1 %v2854_v16 }
 0x16e   : > { %2885 = vmatprep.subr.mxu1 %v1138_v17 }
 0x16f   : > { %2886 = vmatpush3.msra.mxu1 %v1138_v17  ;;  %v770_v17 = vsel %vm754_vm11, 1e-10, %v3683_v4  ;;  %v429_v4 = vld [vmem:[%s4221_s6 + $0x18] sm:$0xff] }
 0x170   : > { %2887 = vmatprep.subr.mxu1 %v2851_v12 }
 0x171   : > { %2888 = vmatpush3.msra.mxu1 %v2851_v12 }
 0x172   : > { %2889 = vmatprep.subr.mxu1 %v1128_v13 }
 0x173   : > { %2890 = vmatpush3.msra.mxu1 %v1128_v13 }
 0x174   : > { %2891 = vmatprep.subr.mxu1 %v2848_v9 }
 0x175   : > { %2892 = vmatpush3.msra.mxu1 %v2848_v9  ;;  %v768_v9 = vsel %vm752_vm9, 1e-10, %v3681_v3 }
 0x176   : > { %2893 = vmatprep.subr.mxu1 %v1118_v32 }
 0x177   : > { %2894 = vmatpush3.msra.mxu1 %v1118_v32  ;;  %v700_v32 = vpop.xlane.xlu1 %699 }
 0x178   : > { %2895 = vmatprep.subr.mxu1 %v3685_v5  ;;  %vm753_vm10 = vcmp.eq.f32.partialorder %v700_v32, 0.0 }
 0x179   : > { %2896 = vmatpush3.msra.mxu1 %v3685_v5  ;;  %v767_v5 = vsel %vm751_vm8, 1e-10, %v694_v60  ;;  %v769_v13 = vsel %vm753_vm10, 1e-10, %v700_v32  ;;  %v957_v60 = vlaneseq }
 0x17a   : > { %2897 = vmatprep.subr.mxu1 %v3689_v8  ;;  %3187 = vrsqrt.f32 %v767_v5 }
 0x17b   : > { %2898 = vmatpush3.msra.mxu1 %v3689_v8  ;;  %v3180_v8 = vpop.eup %3179  ;;  %3189 = vrsqrt.f32 %v768_v9  ;;  %v706_v1 = vpop.xlane.xlu1 %705  ;;  %v958_v62 = vshrl.u32 %v957_v60, 7 }
 0x17c   : > { %v3182_v0 = vpop.eup %3181  ;;  %3191 = vrsqrt.f32 %v769_v13  ;;  %vm755_vm12 = vcmp.eq.f32.partialorder %v706_v1, 0.0  ;;  %2923 = vmatprep.subr.mxu1 %v429_v4 }
 0x17d   : > { %v3184_v12 = vpop.eup %3183  ;;  %3193 = vrsqrt.f32 %v770_v17  ;;  %v771_v20 = vsel %vm755_vm12, 1e-10, %v706_v1 }
 0x17e   : > { %v3186_v16 = vpop.eup %3185  ;;  %3195 = vrsqrt.f32 %v771_v20 }
 0x17f   : > { %v712_v3 = vpop.xlane.xlu1 %711 }
 0x180   : > { %vm757_vm14 = vcmp.eq.f32.partialorder %v712_v3, 0.0 }
 0x183   : > { %v718_v24 = vpop.xlane.xlu1 %717 }
 0x184   : > { %vm759_vm0 = vcmp.eq.f32.partialorder %v718_v24, 0.0 }
 0x185   : > { %v775_v33 = vsel %vm759_vm0, 1e-10, %v718_v24 }
 0x198   : > { %v797_v19 = vpop.trf.xlu0 }
 0x199   : > { %815 = vperm.xlu1 %3173, %v797_v19   ;;  %v3188_v19 = vpop.eup %3187 }
 0x19a   : > { %v3190_v21 = vpop.eup %3189 }
 0x19b   : > { %v3192_v25 = vpop.eup %3191 }
 0x19c   : > { %v798_v23 = vpop.trf.xlu0  ;;  %v3194_v28 = vpop.eup %3193 }
 0x19d   : > { %820 = vperm.xlu1 %3173, %v798_v23   ;;  %v772_v23 = vsel %vm756_vm13, 1e-10, %v3687_v7  ;;  %v724_v7 = vpop.xlane.xlu1 %723 }
 0x19e   : > { %3197 = vrsqrt.f32 %v772_v23  ;;  %vm761_vm3 = vcmp.eq.f32.partialorder %v724_v7, 0.0 }
 0x19f   : > { %v777_v11 = vsel %vm761_vm3, 1e-10, %v724_v7 }
 0x1a0   : > { %v799_v27 = vpop.trf.xlu0 }
 0x1a1   : > { %825 = vperm.xlu1 %3173, %v799_v27   ;;  %v773_v27 = vsel %vm757_vm14, 1e-10, %v712_v3 }
 0x1a2   : > { %3199 = vrsqrt.f32 %v773_v27 }
 0x1a3   : > { %3201 = vrsqrt.f32 %v774_v29 }
 0x1a4   : > { %v800_v31 = vpop.trf.xlu0  ;;  %3203 = vrsqrt.f32 %v775_v33 }
 0x1a5   : > { %830 = vperm.xlu1 %3173, %v800_v31   ;;  %v3196_v31 = vpop.eup %3195 }
 0x1a8   : > { %v801_v36 = vpop.trf.xlu0 }
 0x1a9   : > { %835 = vperm.xlu1 %3173, %v801_v36  }
 0x1ab   : > { %v3198_v36 = vpop.eup %3197 }
 0x1ac   : > { %v802_v37 = vpop.trf.xlu0 }
 0x1ad   : > { %840 = vperm.xlu1 %3173, %v802_v37   ;;  %v776_v37 = vsel %vm760_vm2, 1e-10, %v3693_v15 }
 0x1ae   : > { %3205 = vrsqrt.f32 %v776_v37 }
 0x1af   : > { %3207 = vrsqrt.f32 %v777_v11 }
 0x1b0   : > { %v803_v38 = vpop.trf.xlu0 }
 0x1b1   : > { %845 = vperm.xlu1 %3173, %v803_v38   ;;  %v3200_v38 = vpop.eup %3199 }
 0x1b4   : > { %v804_v40 = vpop.trf.xlu0 }
 0x1b5   : > { %850 = vperm.xlu1 %3173, %v804_v40  }
 0x1b8   : > { %v805_v41 = vpop.trf.xlu0 }
 0x1b9   : > { %855 = vperm.xlu0 %3174, %v805_v41   ;;  %v3202_v41 = vpop.eup %3201 }
 0x1bc   : > { %v806_v42 = vpop.trf.xlu0 }
 0x1bd   : > { %860 = vperm.xlu1 %3173, %v806_v42  }
 0x1c0   : > { %v807_v44 = vpop.trf.xlu0 }
 0x1c1   : > { %865 = vperm.xlu1 %3173, %v807_v44   ;;  %v3204_v44 = vpop.eup %3203 }
 0x1c4   : > { %v808_v45 = vpop.trf.xlu0 }
 0x1c5   : > { %870 = vperm.xlu1 %3173, %v808_v45   ;;  %v3206_v45 = vpop.eup %3205 }
 0x1c8   : > { %v809_v46 = vpop.trf.xlu0 }
 0x1c9   : > { %875 = vperm.xlu1 %3173, %v809_v46  }
 0x1cc   : > { %v810_v48 = vpop.trf.xlu0 }
 0x1cd   : > { %880 = vperm.xlu1 %3173, %v810_v48   ;;  %v3208_v48 = vpop.eup %3207 }
 0x1d0   : > { %v811_v50 = vpop.trf.xlu0 }
 0x1d1   : > { %885 = vperm.xlu1 %3173, %v811_v50  }
 0x1d4   : > { %v812_v51 = vpop.trf.xlu0 }
 0x1d5   : > { %890 = vperm.xlu1 %3173, %v812_v51  }
 0x1fe   : > { %925 = vxpose.xlu1.b32.start [1/16] (narrow) %v3178_v61, 8 }
 0x202   : > { %926 = vxpose.xlu1.b32.cont [2/16] (narrow) %v3180_v8, 8  ;;  %v959_v8 = vsub.s32 0, %v958_v62 }
 0x206   : > { %927 = vxpose.xlu1.b32.cont [3/16] (narrow) %v3182_v0, 8 }
 0x20a   : > { %928 = vxpose.xlu1.b32.cont [4/16] (narrow) %v3184_v12, 8 }
 0x20e   : > { %929 = vxpose.xlu1.b32.cont [5/16] (narrow) %v3186_v16, 8 }
 0x212   : > { %930 = vxpose.xlu1.b32.cont [6/16] (narrow) %v3188_v19, 8  ;;  %v428_v19 = vld [vmem:[%s4221_s6 + $0x10] sm:$0xff] }
 0x214   : > { %v816_v34 = vpop.permute.xlu1 %815 }
 0x215   : > { %v893_v9 = vmul.f32 %v816_v34, %v3584_v56 }
 0x216   : > { %931 = vxpose.xlu1.b32.cont [7/16] (narrow) %v3190_v21, 8 }
 0x218   : > { %v821_v40 = vpop.permute.xlu1 %820 }
 0x219   : > { %v894_v32 = vmul.f32 %v821_v40, %v3589_v59  ;;  %v427_v59 = vld [vmem:[%s4221_s6 + $0x8] sm:$0xff] }
 0x21a   : > { %932 = vxpose.xlu1.b32.cont [8/16] (narrow) %v3192_v25, 8 }
 0x21c   : > { %v826_v42 = vpop.permute.xlu1 %825 }
 0x21d   : > { %v895_v13 = vmul.f32 %v826_v42, %v3596_v63 }
 0x21e   : > { %933 = vxpose.xlu1.b32.cont [9/16] (narrow) %v3194_v28, 8 }
 0x220   : > { %v831_v46 = vpop.permute.xlu1 %830 }
 0x221   : > { %v896_v20 = vmul.f32 %v831_v46, %v3601_v2 }
 0x222   : > { %934 = vxpose.xlu1.b32.cont [10/16] (narrow) %v3196_v31, 8 }
 0x224   : > { %v836_v50 = vpop.permute.xlu1 %835 }
 0x225   : > { %v897_v56 = vmul.f32 %v836_v50, %v3607_v6 }
 0x226   : > { %935 = vxpose.xlu1.b32.cont [11/16] (narrow) %v3198_v36, 8 }
 0x228   : > { %v841_v15 = vpop.permute.xlu1 %840 }
 0x229   : > { %v898_v21 = vmul.f32 %v841_v15, %v3613_v10 }
 0x22a   : > { %936 = vxpose.xlu1.b32.cont [12/16] (narrow) %v3200_v38, 8 }
 0x22c   : > { %v846_v51 = vpop.permute.xlu1 %845 }
 0x22d   : > { %v899_v2 = vmul.f32 %v846_v51, %v3619_v14 }
 0x22e   : > { %937 = vxpose.xlu1.b32.cont [13/16] (narrow) %v3202_v41, 8 }
 0x230   : > { %v851_v52 = vpop.permute.xlu1 %850 }
 0x231   : > { %v900_v25 = vmul.f32 %v851_v52, %v3625_v18 }
 0x232   : > { %938 = vxpose.xlu1.b32.cont [14/16] (narrow) %v3204_v44, 8 }
 0x234   : > { %v856_v6 = vpop.permute.xlu0 %855 }
 0x235   : > { %v901_v27 = vmul.f32 %v856_v6, %v3631_v22 }
 0x236   : > { %939 = vxpose.xlu1.b32.cont [15/16] (narrow) %v3206_v45, 8 }
 0x238   : > { %v861_v53 = vpop.permute.xlu1 %860 }
 0x239   : > { %v902_v14 = vmul.f32 %v861_v53, %v3637_v26 }
 0x23a   : > { %940 = vxpose.xlu1.b32.end [16/16] (narrow) %v3208_v48, 8 }
 0x23c   : > { %v866_v54 = vpop.permute.xlu1 %865 }
 0x23d   : > { %v903_v28 = vmul.f32 %v866_v54, %v3643_v30 }
 0x240   : > { %v871_v55 = vpop.permute.xlu1 %870 }
 0x241   : > { %v904_v22 = vmul.f32 %v871_v55, %v3649_v35 }
 0x244   : > { %v876_v57 = vpop.permute.xlu1 %875 }
 0x245   : > { %v905_v7 = vmul.f32 %v876_v57, %v3655_v39 }
 0x248   : > { %v881_v58 = vpop.permute.xlu1 %880 }
 0x249   : > { %v906_v30 = vmul.f32 %v881_v58, %v3661_v43  ;;  %v426_v43 = vld [vmem:[%s4221_s6] sm:$0xff] }
 0x24c   : > { %v886_v61 = vpop.permute.xlu1 %885 }
 0x24d   : > { %v907_v33 = vmul.f32 %v886_v61, %v3667_v47 }
 0x250   : > { %v891_v5 = vpop.permute.xlu1 %890 }
 0x251   : > { %v908_v39 = vmul.f32 %v891_v5, %v3670_v49  ;;  %v2539_v49 = vld [vmem:[%s4220_s5] ss:$0 sm:$0xff] }
 0x27a   : > { %v941_v0 = vpop.trf.xlu1 }
 0x27b   : > { %v960_v12 = vrot.slane %v941_v0, %v959_v8 }
 0x27d   : > { %v961_v1 = vmul.f32 %v960_v12, %v893_v9  ;;  %v3721_v16 = vmul.f32 %v960_v12, %v894_v32  ;;  %v3723_v17 = vmul.f32 %v960_v12, %v895_v13  ;;  %v3735_v63 = vmul.f32 %v960_v12, %v896_v20 }
 0x27e   : > { %v3737_v3 = vmul.f32 %v960_v12, %v897_v56  ;;  %v3743_v23 = vmul.f32 %v960_v12, %v898_v21  ;;  %v3745_v24 = vmul.f32 %v960_v12, %v899_v2  ;;  %v3751_v10 = vmul.f32 %v960_v12, %v900_v25 }
 0x27f   : > { %2899 = vmatprep.mubr.f32.mxu1 %v961_v1  ;;  %2987 = vmatprep.mubr.f32.mxu0 %v961_v1  ;;  %v3759_v29 = vmul.f32 %v960_v12, %v902_v14  ;;  %v3761_v18 = vmul.f32 %v960_v12, %v903_v28  ;;  %v3767_v31 = vmul.f32 %v960_v12, %v904_v22 }
 0x280   : > { %2900 = vmatmul.mubr.f32.vlgmr.msra.gmra.mxu1 %v3721_v16  ;;  %v3769_v26 = vmul.f32 %v960_v12, %v905_v7  ;;  %v3775_v34 = vmul.f32 %v960_v12, %v906_v30  ;;  %v3777_v35 = vmul.f32 %v960_v12, %v907_v33  ;;  %v3782_v36 = vmul.f32 %v960_v12, %v908_v39 }
 0x281   : > { %2902 = vmatprep.mubr.f32.mxu1 %v3723_v17  ;;  %2924 = vmatpush3.msra.mxu1 %v429_v4  ;;  %v3753_v4 = vmul.f32 %v960_v12, %v901_v27 }
 0x282   : > { %2925 = vmatprep.subr.mxu1 %v428_v19 }
 0x283   : > { %2926 = vmatpush3.msra.mxu1 %v428_v19 }
 0x284   : > { %2903 = vmatmul.mubr.f32.gmra.mxu1 %v3735_v63  ;;  %2927 = vmatprep.subr.mxu1 %v427_v59 }
 0x285   : > { %2905 = vmatprep.mubr.f32.mxu1 %v3737_v3  ;;  %2928 = vmatpush3.msra.mxu1 %v427_v59 }
 0x286   : > { %2929 = vmatprep.subr.mxu1 %v426_v43 }
 0x287   : > { %2930 = vmatpush3.msra.mxu1 %v426_v43 }
 0x288   : > { %2906 = vmatmul.mubr.f32.gmra.mxu1 %v3743_v23 }
 0x289   : > { %2908 = vmatprep.mubr.f32.mxu1 %v3745_v24 }
 0x28c   : > { %2909 = vmatmul.mubr.f32.gmra.mxu1 %v3751_v10 }
 0x28d   : > { %2911 = vmatprep.mubr.f32.mxu1 %v3753_v4 }
 0x290   : > { %2912 = vmatmul.mubr.f32.gmra.mxu1 %v3759_v29 }
 0x291   : > { %2914 = vmatprep.mubr.f32.mxu1 %v3761_v18 }
 0x294   : > { %2915 = vmatmul.mubr.f32.gmra.mxu1 %v3767_v31 }
 0x295   : > { %2917 = vmatprep.mubr.f32.mxu1 %v3769_v26 }
 0x298   : > { %2918 = vmatmul.mubr.f32.gmra.mxu1 %v3775_v34 }
 0x299   : > { %2920 = vmatprep.mubr.f32.mxu1 %v3777_v35 }
 0x29c   : > { %2921 = vmatmul.mubr.f32.gmra.mxu1 %v3782_v36 }
 0x340   : > { %v2901_v47 = vpop.f32.mrf.mxu1 }
 0x341   : > { %v1333_v37 = vmax.f32 %v2901_v47, 0.0 }
 0x342   : > { %v1253_v38 = vpop.f32.mrf.mxu1 }
 0x343   : > { %v1332_v11 = vmax.f32 %v1253_v38, 0.0  ;;  %v1355_v42 = vadd.f32 %v2539_v49, %v1333_v37 }
 0x344   : > { %v2904_v40 = vpop.f32.mrf.mxu1 }
 0x345   : > { %v1354_v41 = vadd.f32 %v2539_v49, %v1332_v11  ;;  %v1335_v44 = vmax.f32 %v2904_v40, 0.0 }
 0x346   : > { %v1263_v45 = vpop.f32.mrf.mxu1 }
 0x347   : > { %v1334_v46 = vmax.f32 %v1263_v45, 0.0  ;;  %2931 = vmatprep.mubr.msk.f32.mxu1 %vm1370_vm4, %v1354_v41  ;;  %v1357_v15 = vadd.f32 %v2539_v49, %v1335_v44 }
 0x348   : > { %v2907_v48 = vpop.f32.mrf.mxu1  ;;  %2932 = vmatmul.mubr.msk.f32.vlgmr.msra.gmra.mxu1 %vm1370_vm4, %v1355_v42 }
 0x349   : > { %v1356_v50 = vadd.f32 %v2539_v49, %v1334_v46  ;;  %v1337_v51 = vmax.f32 %v2907_v48, 0.0 }
 0x34a   : > { %v1273_v52 = vpop.f32.mrf.mxu1 }
 0x34b   : > { %v1336_v53 = vmax.f32 %v1273_v52, 0.0  ;;  %2934 = vmatprep.mubr.msk.f32.mxu1 %vm1370_vm4, %v1356_v50  ;;  %v1359_v57 = vadd.f32 %v2539_v49, %v1337_v51 }
 0x34c   : > { %v2910_v54 = vpop.f32.mrf.mxu1  ;;  %2935 = vmatmul.mubr.msk.f32.gmra.mxu1 %vm1370_vm4, %v1357_v15 }
 0x34d   : > { %v1358_v55 = vadd.f32 %v2539_v49, %v1336_v53  ;;  %v1339_v58 = vmax.f32 %v2910_v54, 0.0 }
 0x34e   : > { %v1283_v60 = vpop.f32.mrf.mxu1 }
 0x34f   : > { %v1338_v61 = vmax.f32 %v1283_v60, 0.0  ;;  %2937 = vmatprep.mubr.msk.f32.mxu1 %vm1370_vm4, %v1358_v55  ;;  %v1361_v8 = vadd.f32 %v2539_v49, %v1339_v58 }
 0x350   : > { %v2913_v62 = vpop.f32.mrf.mxu1  ;;  %2938 = vmatmul.mubr.msk.f32.gmra.mxu1 %vm1370_vm4, %v1359_v57 }
 0x351   : > { %v1360_v5 = vadd.f32 %v2539_v49, %v1338_v61  ;;  %v1341_v0 = vmax.f32 %v2913_v62, 0.0 }
 0x352   : > { %v1293_v9 = vpop.f32.mrf.mxu1 }
 0x353   : > { %v1340_v32 = vmax.f32 %v1293_v9, 0.0  ;;  %2940 = vmatprep.mubr.msk.f32.mxu1 %vm1370_vm4, %v1360_v5  ;;  %v1363_v1 = vadd.f32 %v2539_v49, %v1341_v0 }
 0x354   : > { %v2916_v12 = vpop.f32.mrf.mxu1  ;;  %2941 = vmatmul.mubr.msk.f32.gmra.mxu1 %vm1370_vm4, %v1361_v8 }
 0x355   : > { %v1362_v13 = vadd.f32 %v2539_v49, %v1340_v32  ;;  %v1343_v19 = vmax.f32 %v2916_v12, 0.0 }
 0x356   : > { %v1303_v20 = vpop.f32.mrf.mxu1 }
 0x357   : > { %v1342_v56 = vmax.f32 %v1303_v20, 0.0  ;;  %2943 = vmatprep.mubr.msk.f32.mxu1 %vm1370_vm4, %v1362_v13  ;;  %v1365_v2 = vadd.f32 %v2539_v49, %v1343_v19 }
 0x358   : > { %v2919_v59 = vpop.f32.mrf.mxu1  ;;  %2944 = vmatmul.mubr.msk.f32.gmra.mxu1 %vm1370_vm4, %v1363_v1 }
 0x359   : > { %v1364_v21 = vadd.f32 %v2539_v49, %v1342_v56  ;;  %v1345_v6 = vmax.f32 %v2919_v59, 0.0 }
 0x35a   : > { %v1313_v25 = vpop.f32.mrf.mxu1 }
 0x35b   : > { %v1344_v27 = vmax.f32 %v1313_v25, 0.0  ;;  %2946 = vmatprep.mubr.msk.f32.mxu1 %vm1370_vm4, %v1364_v21  ;;  %v1367_v22 = vadd.f32 %v2539_v49, %v1345_v6 }
 0x35c   : > { %v2922_v14 = vpop.f32.mrf.mxu1  ;;  %2947 = vmatmul.mubr.msk.f32.gmra.mxu1 %vm1370_vm4, %v1365_v2 }
 0x35d   : > { %v1366_v28 = vadd.f32 %v2539_v49, %v1344_v27  ;;  %v1347_v7 = vmax.f32 %v2922_v14, 0.0 }
 0x35e   : > { %v1323_v30 = vpop.f32.mrf.mxu1 }
 0x35f   : > { %v1346_v33 = vmax.f32 %v1323_v30, 0.0  ;;  %2949 = vmatprep.mubr.msk.f32.mxu1 %vm1370_vm4, %v1366_v28  ;;  %v1369_v43 = vadd.f32 %v2539_v49, %v1347_v7 }
 0x360   : > { %2950 = vmatmul.mubr.msk.f32.gmra.mxu1 %vm1370_vm4, %v1367_v22 }
 0x361   : > { %v1368_v39 = vadd.f32 %v2539_v49, %v1346_v33 }
 0x363   : > { %2952 = vmatprep.mubr.msk.f32.mxu1 %vm1370_vm4, %v1368_v39 }
 0x364   : > { %2953 = vmatmul.mubr.msk.f32.gmra.mxu1 %vm1370_vm4, %v1369_v43 }
 0x408   : > { %v2933_v47 = vpop.f32.mrf.mxu1 }
 0x40a   : > { %v1485_v37 = vpop.f32.mrf.mxu1 }
 0x40c   : > { %v2936_v38 = vpop.f32.mrf.mxu1 }
 0x40e   : > { %v1495_v11 = vpop.f32.mrf.mxu1 }
 0x410   : > { %v2939_v40 = vpop.f32.mrf.mxu1 }
 0x412   : > { %v1505_v41 = vpop.f32.mrf.mxu1 }
 0x414   : > { %v2942_v42 = vpop.f32.mrf.mxu1 }
 0x416   : > { %v1515_v44 = vpop.f32.mrf.mxu1 }
 0x418   : > { %v2945_v45 = vpop.f32.mrf.mxu1 }
 0x41a   : > { %v1525_v46 = vpop.f32.mrf.mxu1 }
 0x41c   : > { %v2948_v48 = vpop.f32.mrf.mxu1 }
 0x41e   : > { %v1535_v50 = vpop.f32.mrf.mxu1 }
 0x420   : > { %v2951_v15 = vpop.f32.mrf.mxu1 }
 0x422   : > { %v1545_v51 = vpop.f32.mrf.mxu1 }
 0x424   : > { %v2954_v52 = vpop.f32.mrf.mxu1 }
 0x425   : > { %2955 = vmatprep.subr.mxu0 %v2954_v52 }
 0x426   : > { %v1555_v49 = vpop.f32.mrf.mxu1  ;;  %2956 = vmatpush3.msra.mxu0 %v2954_v52 }
 0x427   : > { %2957 = vmatprep.subr.mxu0 %v1555_v49 }
 0x428   : > { %2958 = vmatpush3.msra.mxu0 %v1555_v49 }
 0x429   : > { %2959 = vmatprep.subr.mxu0 %v2951_v15 }
 0x42a   : > { %2960 = vmatpush3.msra.mxu0 %v2951_v15 }
 0x42b   : > { %2961 = vmatprep.subr.mxu0 %v1545_v51 }
 0x42c   : > { %2962 = vmatpush3.msra.mxu0 %v1545_v51 }
 0x42d   : > { %2963 = vmatprep.subr.mxu0 %v2948_v48 }
 0x42e   : > { %2964 = vmatpush3.msra.mxu0 %v2948_v48 }
 0x42f   : > { %2965 = vmatprep.subr.mxu0 %v1535_v50 }
 0x430   : > { %2966 = vmatpush3.msra.mxu0 %v1535_v50 }
 0x431   : > { %2967 = vmatprep.subr.mxu0 %v2945_v45 }
 0x432   : > { %2968 = vmatpush3.msra.mxu0 %v2945_v45 }
 0x433   : > { %2969 = vmatprep.subr.mxu0 %v1525_v46 }
 0x434   : > { %2970 = vmatpush3.msra.mxu0 %v1525_v46 }
 0x435   : > { %2971 = vmatprep.subr.mxu0 %v2942_v42 }
 0x436   : > { %2972 = vmatpush3.msra.mxu0 %v2942_v42 }
 0x437   : > { %2973 = vmatprep.subr.mxu0 %v1515_v44 }
 0x438   : > { %2974 = vmatpush3.msra.mxu0 %v1515_v44 }
 0x439   : > { %2975 = vmatprep.subr.mxu0 %v2939_v40 }
 0x43a   : > { %2976 = vmatpush3.msra.mxu0 %v2939_v40  ;;  %v3995_v40 = vld [vmem:[%s4224_s9] ss:$0 sm:$0xff] }
 0x43b   : > { %2977 = vmatprep.subr.mxu0 %v1505_v41 }
 0x43c   : > { %2978 = vmatpush3.msra.mxu0 %v1505_v41 }
 0x43d   : > { %2979 = vmatprep.subr.mxu0 %v2936_v38 }
 0x43e   : > { %2980 = vmatpush3.msra.mxu0 %v2936_v38 }
 0x43f   : > { %2981 = vmatprep.subr.mxu0 %v1495_v11 }
 0x440   : > { %2982 = vmatpush3.msra.mxu0 %v1495_v11  ;;  %v3357_v11 = vmov 0.0  }
 0x441   : > { %2983 = vmatprep.subr.mxu0 %v2933_v47 }
 0x442   : > { %2984 = vmatpush3.msra.mxu0 %v2933_v47 }
 0x443   : > { %2985 = vmatprep.subr.mxu0 %v1485_v37 }
 0x444   : > { %2986 = vmatpush3.msra.mxu0 %v1485_v37 }
 0x445   : > { %2988 = vmatmul.mubr.f32.vlgmr.msra.gmra.mxu0 %v3721_v16  ;;  %v432_v16 = vld [vmem:[%s4223_s8 + $0x8] sm:$0xff] }
 0x446   : > { %2990 = vmatprep.mubr.f32.mxu0 %v3723_v17  ;;  %3011 = vmatprep.subr.mxu1 %v432_v16  ;;  %v431_v17 = vld [vmem:[%s4223_s8] sm:$0xff] }
 0x447   : > { %3012 = vmatpush3.msra.mxu1 %v432_v16 }
 0x448   : > { %3013 = vmatprep.subr.mxu1 %v431_v17 }
 0x449   : > { %2991 = vmatmul.mubr.f32.gmra.mxu0 %v3735_v63  ;;  %3014 = vmatpush3.msra.mxu1 %v431_v17 }
 0x44a   : > { %2993 = vmatprep.mubr.f32.mxu0 %v3737_v3 }
 0x44d   : > { %2994 = vmatmul.mubr.f32.gmra.mxu0 %v3743_v23 }
 0x44e   : > { %2996 = vmatprep.mubr.f32.mxu0 %v3745_v24  ;;  %v2556_v24 = vld [vmem:[%s4222_s7] ss:$0 sm:$0xff] }
 0x451   : > { %2997 = vmatmul.mubr.f32.gmra.mxu0 %v3751_v10 }
 0x452   : > { %2999 = vmatprep.mubr.f32.mxu0 %v3753_v4 }
 0x455   : > { %3000 = vmatmul.mubr.f32.gmra.mxu0 %v3759_v29 }
 0x456   : > { %3002 = vmatprep.mubr.f32.mxu0 %v3761_v18 }
 0x459   : > { %3003 = vmatmul.mubr.f32.gmra.mxu0 %v3767_v31 }
 0x45a   : > { %3005 = vmatprep.mubr.f32.mxu0 %v3769_v26 }
 0x45d   : > { %3006 = vmatmul.mubr.f32.gmra.mxu0 %v3775_v34 }
 0x45e   : > { %3008 = vmatprep.mubr.f32.mxu0 %v3777_v35 }
 0x461   : > { %3009 = vmatmul.mubr.f32.gmra.mxu0 %v3782_v36 }
 0x505   : > { %v2989_v63 = vpop.f32.mrf.mxu0 }
 0x506   : > { %v1710_v3 = vmax.f32 %v2989_v63, 0.0 }
 0x507   : > { %v1630_v23 = vpop.f32.mrf.mxu0 }
 0x508   : > { %v1709_v10 = vmax.f32 %v1630_v23, 0.0  ;;  %v3833_v18 = vadd.f32 %v2556_v24, %v1710_v3 }
 0x509   : > { %v2992_v4 = vpop.f32.mrf.mxu0 }
 0x50a   : > { %v3831_v29 = vadd.f32 %v2556_v24, %v1709_v10  ;;  %v1712_v31 = vmax.f32 %v2992_v4, 0.0 }
 0x50b   : > { %v1640_v26 = vpop.f32.mrf.mxu0 }
 0x50c   : > { %v1711_v34 = vmax.f32 %v1640_v26, 0.0  ;;  %3015 = vmatprep.mubr.msk.f32.mxu1 %vm993_vm1, %v3831_v29  ;;  %3071 = vmatprep.mubr.msk.f32.mxu0 %vm993_vm1, %v3831_v29  ;;  %v3843_v53 = vadd.f32 %v2556_v24, %v1712_v31 }
 0x50d   : > { %v2995_v35 = vpop.f32.mrf.mxu0  ;;  %3016 = vmatmul.mubr.msk.f32.vlgmr.msra.gmra.mxu1 %vm993_vm1, %v3833_v18 }
 0x50e   : > { %v3841_v36 = vadd.f32 %v2556_v24, %v1711_v34  ;;  %v1714_v54 = vmax.f32 %v2995_v35, 0.0 }
 0x50f   : > { %v1650_v55 = vpop.f32.mrf.mxu0 }
 0x510   : > { %v1713_v57 = vmax.f32 %v1650_v55, 0.0  ;;  %3018 = vmatprep.mubr.msk.f32.mxu1 %vm993_vm1, %v3841_v36  ;;  %v3851_v61 = vadd.f32 %v2556_v24, %v1714_v54 }
 0x511   : > { %v2998_v58 = vpop.f32.mrf.mxu0  ;;  %3019 = vmatmul.mubr.msk.f32.gmra.mxu1 %vm993_vm1, %v3843_v53 }
 0x512   : > { %v3849_v60 = vadd.f32 %v2556_v24, %v1713_v57  ;;  %v1716_v62 = vmax.f32 %v2998_v58, 0.0 }
 0x513   : > { %v1660_v5 = vpop.f32.mrf.mxu0 }
 0x514   : > { %v1715_v8 = vmax.f32 %v1660_v5, 0.0  ;;  %3021 = vmatprep.mubr.msk.f32.mxu1 %vm993_vm1, %v3849_v60  ;;  %v3859_v32 = vadd.f32 %v2556_v24, %v1716_v62 }
 0x515   : > { %v3001_v0 = vpop.f32.mrf.mxu0  ;;  %3022 = vmatmul.mubr.msk.f32.gmra.mxu1 %vm993_vm1, %v3851_v61 }
 0x516   : > { %v3857_v9 = vadd.f32 %v2556_v24, %v1715_v8  ;;  %v1718_v12 = vmax.f32 %v3001_v0, 0.0 }
 0x517   : > { %v1670_v13 = vpop.f32.mrf.mxu0 }
 0x518   : > { %v1717_v1 = vmax.f32 %v1670_v13, 0.0  ;;  %3024 = vmatprep.mubr.msk.f32.mxu1 %vm993_vm1, %v3857_v9  ;;  %v3867_v56 = vadd.f32 %v2556_v24, %v1718_v12 }
 0x519   : > { %v3004_v19 = vpop.f32.mrf.mxu0  ;;  %3025 = vmatmul.mubr.msk.f32.gmra.mxu1 %vm993_vm1, %v3859_v32 }
 0x51a   : > { %v3865_v20 = vadd.f32 %v2556_v24, %v1717_v1  ;;  %v1720_v59 = vmax.f32 %v3004_v19, 0.0 }
 0x51b   : > { %v1680_v21 = vpop.f32.mrf.mxu0 }
 0x51c   : > { %v1719_v2 = vmax.f32 %v1680_v21, 0.0  ;;  %3027 = vmatprep.mubr.msk.f32.mxu1 %vm993_vm1, %v3865_v20  ;;  %v3875_v27 = vadd.f32 %v2556_v24, %v1720_v59 }
 0x51d   : > { %v3007_v6 = vpop.f32.mrf.mxu0  ;;  %3028 = vmatmul.mubr.msk.f32.gmra.mxu1 %vm993_vm1, %v3867_v56 }
 0x51e   : > { %v3873_v25 = vadd.f32 %v2556_v24, %v1719_v2  ;;  %v1722_v14 = vmax.f32 %v3007_v6, 0.0 }
 0x51f   : > { %v1690_v28 = vpop.f32.mrf.mxu0 }
 0x520   : > { %v1721_v22 = vmax.f32 %v1690_v28, 0.0  ;;  %3030 = vmatprep.mubr.msk.f32.mxu1 %vm993_vm1, %v3873_v25  ;;  %v3883_v39 = vadd.f32 %v2556_v24, %v1722_v14 }
 0x521   : > { %v3010_v7 = vpop.f32.mrf.mxu0  ;;  %3031 = vmatmul.mubr.msk.f32.gmra.mxu1 %vm993_vm1, %v3875_v27 }
 0x522   : > { %v3881_v30 = vadd.f32 %v2556_v24, %v1721_v22  ;;  %v1724_v33 = vmax.f32 %v3010_v7, 0.0 }
 0x523   : > { %v1700_v43 = vpop.f32.mrf.mxu0 }
 0x524   : > { %v3885_v47 = vadd.f32 %v2556_v24, %v1724_v33  ;;  %v1723_v37 = vmax.f32 %v1700_v43, 0.0  ;;  %3033 = vmatprep.mubr.msk.f32.mxu1 %vm993_vm1, %v3881_v30 }
 0x525   : > { %3034 = vmatmul.mubr.msk.f32.gmra.mxu1 %vm993_vm1, %v3883_v39 }
 0x526   : > { %v3891_v38 = vadd.f32 %v2556_v24, %v1723_v37  ;;  %3039 = vmatprep.subr.msk.mxu0 %vm993_vm1, %v3885_v47 }
 0x527   : > { %3040 = vmatpush3.xpose.msk.msra.mxu0 %vm993_vm1, %v3885_v47 }
 0x528   : > { %3036 = vmatprep.mubr.msk.f32.mxu1 %vm993_vm1, %v3891_v38  ;;  %3041 = vmatprep.subr.msk.mxu0 %vm993_vm1, %v3891_v38 }
 0x529   : > { %3037 = vmatmul.mubr.msk.f32.gmra.mxu1 %vm993_vm1, %v3885_v47 }
 0x52b   : > { %3042 = vmatpush3.xpose.msk.msra.mxu0 %vm993_vm1, %v3891_v38 }
 0x52c   : > { %3043 = vmatprep.subr.msk.mxu0 %vm993_vm1, %v3883_v39 }
 0x52f   : > { %3044 = vmatpush3.xpose.msk.msra.mxu0 %vm993_vm1, %v3883_v39 }
 0x530   : > { %3045 = vmatprep.subr.msk.mxu0 %vm993_vm1, %v3881_v30 }
 0x533   : > { %3046 = vmatpush3.xpose.msk.msra.mxu0 %vm993_vm1, %v3881_v30 }
 0x534   : > { %3047 = vmatprep.subr.msk.mxu0 %vm993_vm1, %v3875_v27 }
 0x537   : > { %3048 = vmatpush3.xpose.msk.msra.mxu0 %vm993_vm1, %v3875_v27 }
 0x538   : > { %3049 = vmatprep.subr.msk.mxu0 %vm993_vm1, %v3873_v25 }
 0x53b   : > { %3050 = vmatpush3.xpose.msk.msra.mxu0 %vm993_vm1, %v3873_v25 }
 0x53c   : > { %3051 = vmatprep.subr.msk.mxu0 %vm993_vm1, %v3867_v56 }
 0x53f   : > { %3052 = vmatpush3.xpose.msk.msra.mxu0 %vm993_vm1, %v3867_v56 }
 0x540   : > { %3053 = vmatprep.subr.msk.mxu0 %vm993_vm1, %v3865_v20 }
 0x543   : > { %3054 = vmatpush3.xpose.msk.msra.mxu0 %vm993_vm1, %v3865_v20 }
 0x544   : > { %3055 = vmatprep.subr.msk.mxu0 %vm993_vm1, %v3859_v32 }
 0x547   : > { %3056 = vmatpush3.xpose.msk.msra.mxu0 %vm993_vm1, %v3859_v32 }
 0x548   : > { %3057 = vmatprep.subr.msk.mxu0 %vm993_vm1, %v3857_v9 }
 0x54b   : > { %3058 = vmatpush3.xpose.msk.msra.mxu0 %vm993_vm1, %v3857_v9 }
 0x54c   : > { %3059 = vmatprep.subr.msk.mxu0 %vm993_vm1, %v3851_v61 }
 0x54f   : > { %3060 = vmatpush3.xpose.msk.msra.mxu0 %vm993_vm1, %v3851_v61 }
 0x550   : > { %3061 = vmatprep.subr.msk.mxu0 %vm993_vm1, %v3849_v60 }
 0x553   : > { %3062 = vmatpush3.xpose.msk.msra.mxu0 %vm993_vm1, %v3849_v60 }
 0x554   : > { %3063 = vmatprep.subr.msk.mxu0 %vm993_vm1, %v3843_v53 }
 0x557   : > { %3064 = vmatpush3.xpose.msk.msra.mxu0 %vm993_vm1, %v3843_v53 }
 0x558   : > { %3065 = vmatprep.subr.msk.mxu0 %vm993_vm1, %v3841_v36 }
 0x55b   : > { %3066 = vmatpush3.xpose.msk.msra.mxu0 %vm993_vm1, %v3841_v36 }
 0x55c   : > { %3067 = vmatprep.subr.msk.mxu0 %vm993_vm1, %v3833_v18 }
 0x55f   : > { %3068 = vmatpush3.xpose.msk.msra.mxu0 %vm993_vm1, %v3833_v18 }
 0x560   : > { %3069 = vmatprep.subr.msk.mxu0 %vm993_vm1, %v3831_v29 }
 0x563   : > { %3070 = vmatpush3.xpose.msk.msra.mxu0 %vm993_vm1, %v3831_v29 }
 0x564   : > { %3095 = vmatprep.subr.mxu0 %v3357_v11 }
 0x566   : > { %3072 = vmatmul.mubr.msk.f32.vlgmr.msra.gmra.mxu0 %vm993_vm1, %v3833_v18 }
 0x567   : > { %3074 = vmatprep.mubr.msk.f32.mxu0 %vm993_vm1, %v3841_v36 }
 0x56a   : > { %3075 = vmatmul.mubr.msk.f32.gmra.mxu0 %vm993_vm1, %v3843_v53 }
 0x56b   : > { %3077 = vmatprep.mubr.msk.f32.mxu0 %vm993_vm1, %v3849_v60 }
 0x56e   : > { %3078 = vmatmul.mubr.msk.f32.gmra.mxu0 %vm993_vm1, %v3851_v61 }
 0x56f   : > { %3080 = vmatprep.mubr.msk.f32.mxu0 %vm993_vm1, %v3857_v9 }
 0x572   : > { %3081 = vmatmul.mubr.msk.f32.gmra.mxu0 %vm993_vm1, %v3859_v32 }
 0x573   : > { %3083 = vmatprep.mubr.msk.f32.mxu0 %vm993_vm1, %v3865_v20 }
 0x576   : > { %3084 = vmatmul.mubr.msk.f32.gmra.mxu0 %vm993_vm1, %v3867_v56 }
 0x577   : > { %3086 = vmatprep.mubr.msk.f32.mxu0 %vm993_vm1, %v3873_v25 }
 0x57a   : > { %3087 = vmatmul.mubr.msk.f32.gmra.mxu0 %vm993_vm1, %v3875_v27 }
 0x57b   : > { %3089 = vmatprep.mubr.msk.f32.mxu0 %vm993_vm1, %v3881_v30 }
 0x57e   : > { %3090 = vmatmul.mubr.msk.f32.gmra.mxu0 %vm993_vm1, %v3883_v39 }
 0x57f   : > { %3092 = vmatprep.mubr.msk.f32.mxu0 %vm993_vm1, %v3891_v38 }
 0x582   : > { %3093 = vmatmul.mubr.msk.f32.gmra.mxu0 %vm993_vm1, %v3885_v47  ;;  %vm3358_vm1 = vmmov 0  }
 0x583   : > { %3127 = vmatprep.mubr.msk.f32.mxu0 %vm3358_vm1, %v3357_v11 }
 0x5cd   : > { %v3017_v41 = vpop.f32.mrf.mxu1 }
 0x5ce   : > { %v1873_v42 = vadd.f32 %v3017_v41, %v3995_v40 }
 0x5cf   : > { %v1867_v44 = vpop.f32.mrf.mxu1 }
 0x5d0   : > { %v2575_v45 = vmul.f32 -1.442695, %v1873_v42  ;;  %v1868_v46 = vadd.f32 %v3995_v40, %v1867_v44 }
 0x5d1   : > { %v3020_v48 = vpop.f32.mrf.mxu1 }
 0x5d2   : > { %3209 = vpow2.f32 %v2575_v45  ;;  %v2574_v50 = vmul.f32 -1.442695, %v1868_v46  ;;  %v1883_v15 = vadd.f32 %v3020_v48, %v3995_v40 }
 0x5d3   : > { %v1877_v51 = vpop.f32.mrf.mxu1 }
 0x5d4   : > { %3211 = vpow2.f32 %v2574_v50  ;;  %v2577_v52 = vmul.f32 -1.442695, %v1883_v15  ;;  %v1878_v49 = vadd.f32 %v3995_v40, %v1877_v51 }
 0x5d5   : > { %v3023_v16 = vpop.f32.mrf.mxu1 }
 0x5d6   : > { %3213 = vpow2.f32 %v2577_v52  ;;  %v2576_v17 = vmul.f32 -1.442695, %v1878_v49  ;;  %v1893_v63 = vadd.f32 %v3023_v16, %v3995_v40 }
 0x5d7   : > { %v1887_v3 = vpop.f32.mrf.mxu1 }
 0x5d8   : > { %v1888_v23 = vadd.f32 %v3995_v40, %v1887_v3  ;;  %3215 = vpow2.f32 %v2576_v17  ;;  %v2579_v10 = vmul.f32 -1.442695, %v1893_v63 }
 0x5d9   : > { %v3026_v24 = vpop.f32.mrf.mxu1 }
 0x5da   : > { %v1903_v31 = vadd.f32 %v3026_v24, %v3995_v40  ;;  %v2578_v26 = vmul.f32 -1.442695, %v1888_v23  ;;  %3217 = vpow2.f32 %v2579_v10 }
 0x5db   : > { %v1897_v4 = vpop.f32.mrf.mxu1 }
 0x5dc   : > { %v2581_v57 = vmul.f32 -1.442695, %v1903_v31  ;;  %3219 = vpow2.f32 %v2578_v26  ;;  %v1898_v5 = vadd.f32 %v3995_v40, %v1897_v4 }
 0x5dd   : > { %v3029_v34 = vpop.f32.mrf.mxu1 }
 0x5de   : > { %v2580_v1 = vmul.f32 -1.442695, %v1898_v5  ;;  %v1913_v19 = vadd.f32 %v3029_v34, %v3995_v40 }
 0x5df   : > { %v3210_v35 = vpop.eup %3209  ;;  %v1907_v54 = vpop.f32.mrf.mxu1 }
 0x5e0   : > { %v1995_v55 = vadd.f32 1.0, %v3210_v35  ;;  %v1908_v58 = vadd.f32 %v3995_v40, %v1907_v54  ;;  %v2583_v6 = vmul.f32 -1.442695, %v1913_v19 }
 0x5e1   : > { %v3212_v62 = vpop.eup %3211  ;;  %v3032_v12 = vpop.f32.mrf.mxu1 }
 0x5e2   : > { %3221 = vrcp.f32 %v1995_v55  ;;  %v1994_v8 = vadd.f32 1.0, %v3212_v62  ;;  %v2582_v0 = vmul.f32 -1.442695, %v1908_v58  ;;  %v1923_v14 = vadd.f32 %v3032_v12, %v3995_v40 }
 0x5e3   : > { %v3214_v13 = vpop.eup %3213  ;;  %3223 = vpow2.f32 %v2581_v57  ;;  %v1917_v21 = vpop.f32.mrf.mxu1 }
 0x5e4   : > { %3225 = vpow2.f32 %v2582_v0  ;;  %v1997_v59 = vadd.f32 1.0, %v3214_v13  ;;  %v1918_v33 = vadd.f32 %v3995_v40, %v1917_v21  ;;  %v2585_v43 = vmul.f32 -1.442695, %v1923_v14 }
 0x5e5   : > { %3227 = vrcp.f32 %v1994_v8  ;;  %v3216_v2 = vpop.eup %3215  ;;  %v3035_v22 = vpop.f32.mrf.mxu1 }
 0x5e6   : > { %3229 = vpow2.f32 %v2580_v1  ;;  %v1996_v28 = vadd.f32 1.0, %v3216_v2  ;;  %v2584_v45 = vmul.f32 -1.442695, %v1918_v33  ;;  %v1933_v48 = vadd.f32 %v3035_v22, %v3995_v40 }
 0x5e7   : > { %3231 = vrcp.f32 %v1997_v59  ;;  %v3218_v7 = vpop.eup %3217  ;;  %v1927_v42 = vpop.f32.mrf.mxu1 }
 0x5e8   : > { %3233 = vpow2.f32 %v2583_v6  ;;  %v1999_v41 = vadd.f32 1.0, %v3218_v7  ;;  %v2587_v16 = vmul.f32 -1.442695, %v1933_v48  ;;  %v1928_v17 = vadd.f32 %v3995_v40, %v1927_v42 }
 0x5e9   : > { %v3220_v37 = vpop.eup %3219  ;;  %3235 = vrcp.f32 %v1996_v28  ;;  %v3038_v51 = vpop.f32.mrf.mxu1 }
 0x5ea   : > { %3237 = vpow2.f32 %v2585_v43  ;;  %v1998_v15 = vadd.f32 1.0, %v3220_v37  ;;  %v2586_v10 = vmul.f32 -1.442695, %v1928_v17  ;;  %v1943_v35 = vadd.f32 %v3038_v51, %v3995_v40 }
 0x5eb   : > { %3239 = vrcp.f32 %v1999_v41  ;;  %v1937_v23 = vpop.f32.mrf.mxu1 }
 0x5ec   : > { %3241 = vpow2.f32 %v2584_v45  ;;  %v1938_v4 = vadd.f32 %v3995_v40, %v1937_v23  ;;  %v2589_v5 = vmul.f32 -1.442695, %v1943_v35 }
 0x5ee   : > { %v2588_v54 = vmul.f32 -1.442695, %v1938_v4  ;;  %v3277_v4 = vld [vmem:[%s4232_s1 + $0x78] sm:$0xff] }
 0x5ef   : > { %v3222_v44 = vpop.eup %3221 }
 0x5f0   : > { %2060 = vrot.lane.b32.xlu0 %v3222_v44, %s3359_s29  ;;  %v3224_v46 = vpop.eup %3223 }
 0x5f1   : > { %v3226_v50 = vpop.eup %3225  ;;  %v2001_v3 = vadd.f32 1.0, %v3224_v46 }
 0x5f2   : > { %v3228_v52 = vpop.eup %3227  ;;  %v2002_v49 = vadd.f32 1.0, %v3226_v50 }
 0x5f3   : > { %v3230_v63 = vpop.eup %3229 }
 0x5f4   : > { %2058 = vrot.lane.b32.xlu0 %v3228_v52, %s3359_s29  ;;  %3243 = vrcp.f32 %v2002_v49  ;;  %v3232_v24 = vpop.eup %3231  ;;  %v2000_v26 = vadd.f32 1.0, %v3230_v63 }
 0x5f5   : > { %3245 = vrcp.f32 %v1998_v15  ;;  %v3234_v31 = vpop.eup %3233 }
 0x5f6   : > { %3247 = vpow2.f32 %v2587_v16  ;;  %v3236_v34 = vpop.eup %3235  ;;  %v2003_v57 = vadd.f32 1.0, %v3234_v31 }
 0x5f7   : > { %3249 = vrcp.f32 %v2001_v3  ;;  %v3238_v55 = vpop.eup %3237 }
 0x5f8   : > { %2064 = vrot.lane.b32.xlu0 %v3232_v24, %s3359_s29  ;;  %3251 = vpow2.f32 %v2586_v10  ;;  %v3240_v58 = vpop.eup %3239  ;;  %v2005_v0 = vadd.f32 1.0, %v3238_v55 }
 0x5f9   : > { %3253 = vrcp.f32 %v2000_v26  ;;  %v3242_v62 = vpop.eup %3241 }
 0x5fa   : > { %3255 = vpow2.f32 %v2588_v54  ;;  %v2004_v13 = vadd.f32 1.0, %v3242_v62  ;;  %v3279_v54 = vld [vmem:[%s4232_s1 + $0x68] sm:$0xff]  ;;  %v3281_v62 = vld [vmem:[%s4232_s1 + $0x58] sm:$0xff] }
 0x5fb   : > { %3257 = vrcp.f32 %v2003_v57  ;;  %v3280_v57 = vld [vmem:[%s4232_s1 + $0x60] sm:$0xff] }
 0x5fc   : > { %2062 = vrot.lane.b32.xlu0 %v3236_v34, %s3359_s29  ;;  %3259 = vpow2.f32 %v2589_v5  ;;  %v3278_v34 = vld [vmem:[%s4232_s1 + $0x70] sm:$0xff] }
 0x5fd   : > { %3261 = vrcp.f32 %v2005_v0 }
 0x5fe   : > { %3263 = vrcp.f32 %v2004_v13  ;;  %v3284_v13 = vld [vmem:[%s4232_s1 + $0x40] sm:$0xff] }
 0x600   : > { %2068 = vrot.lane.b32.xlu0 %v3240_v58, %s3359_s29 }
 0x601   : > { %v3244_v8 = vpop.eup %3243 }
 0x602   : > { %v3246_v12 = vpop.eup %3245  ;;  %2074 = vrot.lane.b32.xlu1 %v3244_v8, %s3359_s29  ;;  %v3282_v8 = vld [vmem:[%s4232_s1 + $0x50] sm:$0xff] }
 0x603   : > { %v3248_v40 = vpop.eup %3247 }
 0x604   : > { %2066 = vrot.lane.b32.xlu0 %v3246_v12, %s3359_s29  ;;  %v3250_v1 = vpop.eup %3249  ;;  %v2007_v59 = vadd.f32 1.0, %v3248_v40  ;;  %v3283_v12 = vld [vmem:[%s4232_s1 + $0x48] sm:$0xff] }
 0x605   : > { %v3252_v19 = vpop.eup %3251 }
 0x606   : > { %v3254_v21 = vpop.eup %3253  ;;  %3265 = vrcp.f32 %v2007_v59  ;;  %v2006_v6 = vadd.f32 1.0, %v3252_v19  ;;  %v3285_v19 = vld [vmem:[%s4232_s1 + $0x38] sm:$0xff] }
 0x607   : > { %v3256_v2 = vpop.eup %3255 }
 0x608   : > { %2072 = vrot.lane.b32.xlu0 %v3250_v1, %s3359_s29  ;;  %v3258_v14 = vpop.eup %3257  ;;  %3267 = vrcp.f32 %v2006_v6  ;;  %v2008_v22 = vadd.f32 1.0, %v3256_v2  ;;  %v3287_v6 = vld [vmem:[%s4232_s1 + $0x28] sm:$0xff] }
 0x609   : > { %v3260_v28 = vpop.eup %3259 }
 0x60a   : > { %v3262_v7 = vpop.eup %3261  ;;  %v2009_v33 = vadd.f32 1.0, %v3260_v28  ;;  %3269 = vrcp.f32 %v2008_v22  ;;  %v3288_v28 = vld [vmem:[%s4232_s1 + $0x20] sm:$0xff] }
 0x60b   : > { %v3264_v43 = vpop.eup %3263 }
 0x60c   : > { %2070 = vrot.lane.b32.xlu0 %v3254_v21, %s3359_s29  ;;  %3271 = vrcp.f32 %v2009_v33  ;;  %v3286_v21 = vld [vmem:[%s4232_s1 + $0x30] sm:$0xff] }
 0x610   : > { %2076 = vrot.lane.b32.xlu0 %v3258_v14, %s3359_s29 }
 0x613   : > { %v3266_v37 = vpop.eup %3265 }
 0x614   : > { %2080 = vrot.lane.b32.xlu0 %v3262_v7, %s3359_s29  ;;  %v3289_v7 = vld [vmem:[%s4232_s1 + $0x18] sm:$0xff] }
 0x615   : > { %v3268_v41 = vpop.eup %3267 }
 0x617   : > { %v3270_v42 = vpop.eup %3269 }
 0x618   : > { %2078 = vrot.lane.b32.xlu0 %v3264_v43, %s3359_s29  ;;  %v3290_v43 = vld [vmem:[%s4232_s1 + $0x10] sm:$0xff] }
 0x619   : > { %v3272_v45 = vpop.eup %3271 }
 0x61c   : > { %2084 = vrot.lane.b32.xlu0 %v3266_v37, %s3359_s29 }
 0x620   : > { %2082 = vrot.lane.b32.xlu0 %v3268_v41, %s3359_s29  ;;  %v3291_v41 = vld [vmem:[%s4232_s1 + $0x8] sm:$0xff] }
 0x624   : > { %2086 = vrot.lane.b32.xlu0 %v3270_v42, %s3359_s29 }
 0x626   : > { %v4029_v44 = vpop.f32.mrf.mxu0 }
 0x627   : > { %v2285_v42 = vmul.f32 %v3291_v41, %v4029_v44 }
 0x628   : > { %v4031_v46 = vpop.f32.mrf.mxu0  ;;  %2088 = vrot.lane.b32.xlu0 %v3272_v45, %s3359_s29  ;;  %v3292_v45 = vld [vmem:[%s4232_s1] sm:$0xff]  ;;  %s4180_s29 = scalar_lea.hbm %s4226_s11, %s2624_s14 }
 0x62a   : > { %v3076_v48 = vpop.f32.mrf.mxu0 }
 0x62b   : > { %v2287_v33 = vmul.f32 %v3289_v7, %v3076_v48  ;;  %v2284_v48 = vmul.f32 %v3292_v45, %v4031_v46  ;;  %v3293_v46 = vld [vmem:[%s4231_s0] sm:$0xff]  ;;  %s3360_s0 = smov [#allocation2]  }
 0x62c   : > { %v4034_v50 = vpop.f32.mrf.mxu0  ;;  %s3298_s1 = sshll.u32 %s3360_s0, 4  ;;  %s3299_s1 = int_to_ptr.vmem [resolvable:$false] %s3298_s1 }
 0x62d   : > { %v2286_v37 = vmul.f32 %v3290_v43, %v4034_v50  ;;  %s3300_s21 = scalar_lea.vmem %s3299_s1, 256  ;;  %p3301_p0 = scmp.lt.s32.totalorder %s2401_s16, %s3299_s1 }
 0x62e   : > { %v3079_v15 = vpop.f32.mrf.mxu0  ;;  %p3302_p1 = scmp.lt.s32.totalorder %s3300_s21, %s3294_s30 }
 0x62f   : > { %v2289_v14 = vmul.f32 %v3287_v6, %v3079_v15 }
 0x630   : > { %v2225_v51 = vpop.f32.mrf.mxu0  ;;  %p3303_p2 = por %p3302_p1, %p3301_p0 }
 0x631   : > { %v2288_v22 = vmul.f32 %v3288_v28, %v2225_v51 }
 0x632   : > { %v3082_v52 = vpop.f32.mrf.mxu0  ;;  %p3304_p3 = pnand %p3303_p2, %p3297_p13 }
 0x633   : > { %v2291_v59 = vmul.f32 %v3285_v19, %v3082_v52 }
 0x634   : > { %v2235_v49 = vpop.f32.mrf.mxu0 }
 0x635   : > { %v2290_v2 = vmul.f32 %v3286_v21, %v2235_v49 }
 0x636   : > { %v3085_v16 = vpop.f32.mrf.mxu0 }
 0x637   : > { %v2293_v40 = vmul.f32 %v3283_v12, %v3085_v16 }
 0x638   : > { %v2245_v17 = vpop.f32.mrf.mxu0 }
 0x639   : > { %v2292_v1 = vmul.f32 %v3284_v13, %v2245_v17 }
 0x63a   : > { %v3088_v63 = vpop.f32.mrf.mxu0 }
 0x63b   : > { %v2295_v5 = vmul.f32 %v3281_v62, %v3088_v63 }
 0x63c   : > { %v2255_v3 = vpop.f32.mrf.mxu0 }
 0x63d   : > { %v2294_v0 = vmul.f32 %v3282_v8, %v2255_v3 }
 0x63e   : > { %v3091_v23 = vpop.f32.mrf.mxu0 }
 0x63f   : > { %v2297_v55 = vmul.f32 %v3279_v54, %v3091_v23 }
 0x640   : > { %v2265_v24 = vpop.f32.mrf.mxu0 }
 0x641   : > { %v2296_v58 = vmul.f32 %v3280_v57, %v2265_v24 }
 0x642   : > { %v3094_v10 = vpop.f32.mrf.mxu0 }
 0x643   : > { %v2299_v31 = vmul.f32 %v3277_v4, %v3094_v10 }
 0x644   : > { %v2275_v26 = vpop.f32.mrf.mxu0 }
 0x645   : > { %v2298_v35 = vmul.f32 %v3278_v34, %v2275_v26  ;;  %3096 = vmatpush3.msra.mxu0 %v2299_v31 }
 0x646   : > { %3097 = vmatprep.subr.mxu0 %v3357_v11 }
 0x647   : > { %3098 = vmatpush3.msra.mxu0 %v2298_v35 }
 0x648   : > { %3099 = vmatprep.subr.mxu0 %v3357_v11 }
 0x649   : > { %3100 = vmatpush3.msra.mxu0 %v2297_v55 }
 0x64a   : > { %3101 = vmatprep.subr.mxu0 %v3357_v11 }
 0x64b   : > { %3102 = vmatpush3.msra.mxu0 %v2296_v58 }
 0x64c   : > { %3103 = vmatprep.subr.mxu0 %v3357_v11 }
 0x64d   : > { %3104 = vmatpush3.msra.mxu0 %v2295_v5 }
 0x64e   : > { %3105 = vmatprep.subr.mxu0 %v3357_v11 }
 0x64f   : > { %3106 = vmatpush3.msra.mxu0 %v2294_v0 }
 0x650   : > { %3107 = vmatprep.subr.mxu0 %v3357_v11 }
 0x651   : > { %3108 = vmatpush3.msra.mxu0 %v2293_v40 }
 0x652   : > { %3109 = vmatprep.subr.mxu0 %v3357_v11 }
 0x653   : > { %3110 = vmatpush3.msra.mxu0 %v2292_v1 }
 0x654   : > { %3111 = vmatprep.subr.mxu0 %v3357_v11 }
 0x655   : > { %3112 = vmatpush3.msra.mxu0 %v2291_v59 }
 0x656   : > { %3113 = vmatprep.subr.mxu0 %v3357_v11 }
 0x657   : > { %3114 = vmatpush3.msra.mxu0 %v2290_v2 }
 0x658   : > { %3115 = vmatprep.subr.mxu0 %v3357_v11 }
 0x659   : > { %3116 = vmatpush3.msra.mxu0 %v2289_v14 }
 0x65a   : > { %3117 = vmatprep.subr.mxu0 %v3357_v11 }
 0x65b   : > { %3118 = vmatpush3.msra.mxu0 %v2288_v22 }
 0x65c   : > { %3119 = vmatprep.subr.mxu0 %v3357_v11 }
 0x65d   : > { %3120 = vmatpush3.msra.mxu0 %v2287_v33 }
 0x65e   : > { %3121 = vmatprep.subr.mxu0 %v3357_v11 }
 0x65f   : > { %3122 = vmatpush3.msra.mxu0 %v2286_v37 }
 0x660   : > { %3123 = vmatprep.subr.mxu0 %v3357_v11 }
 0x661   : > { %3124 = vmatpush3.msra.mxu0 %v2285_v42 }
 0x662   : > { %v2061_v44 = vpop.permute.xlu0 %2060  ;;  %3125 = vmatprep.subr.mxu0 %v3357_v11 }
 0x663   : > { %v2107_v50 = vsel %vm1370_vm4, %v3833_v18, %v2061_v44  ;;  %3126 = vmatpush3.msra.mxu0 %v2284_v48 }
 0x664   : > { %2124 = vst.msk [vmem:[%s4105_s25 + $0x8] sm:$0xff] %vm2122_vm5, %v2107_v50  ;;  %3128 = vmatmul.mubr.f32.vlgmr.msra.gmra.mxu0 %v3293_v46 }
 0x666   : > { %v2059_v15 = vpop.permute.xlu0 %2058 }
 0x667   : > { %v2106_v51 = vsel %vm1370_vm4, %v3831_v29, %v2059_v15 }
 0x668   : > { %2123 = vst.msk [vmem:[%s4105_s25] sm:$0xff] %vm2122_vm5, %v2106_v51 }
 0x66a   : > { %v2065_v11 = vpop.permute.xlu0 %2064 }
 0x66b   : > { %v2109_v18 = vsel %vm1370_vm4, %v3843_v53, %v2065_v11 }
 0x66c   : > { %2126 = vst.msk [vmem:[%s4105_s25 + $0x18] sm:$0xff] %vm2122_vm5, %v2109_v18 }
 0x66e   : > { %v2063_v52 = vpop.permute.xlu0 %2062 }
 0x66f   : > { %v2108_v49 = vsel %vm1370_vm4, %v3841_v36, %v2063_v52 }
 0x670   : > { %2125 = vst.msk [vmem:[%s4105_s25 + $0x10] sm:$0xff] %vm2122_vm5, %v2108_v49 }
 0x672   : > { %v2069_v16 = vpop.permute.xlu0 %2068 }
 0x673   : > { %v2111_v29 = vsel %vm1370_vm4, %v3851_v61, %v2069_v16 }
 0x674   : > { %2128 = vst.msk [vmem:[%s4105_s25 + $0x28] sm:$0xff] %vm2122_vm5, %v2111_v29  ;;  %v2075_v17 = vpop.permute.xlu1 %2074 }
 0x675   : > { %v2114_v53 = vsel %vm1370_vm4, %v3865_v20, %v2075_v17 }
 0x676   : > { %v2067_v63 = vpop.permute.xlu0 %2066  ;;  %2131 = vst.msk [vmem:[%s4105_s25 + $0x40] sm:$0xff] %vm2122_vm5, %v2114_v53 }
 0x677   : > { %v2110_v36 = vsel %vm1370_vm4, %v3849_v60, %v2067_v63 }
 0x678   : > { %2127 = vst.msk [vmem:[%s4105_s25 + $0x20] sm:$0xff] %vm2122_vm5, %v2110_v36 }
 0x67a   : > { %v2073_v3 = vpop.permute.xlu0 %2072 }
 0x67b   : > { %v2113_v61 = vsel %vm1370_vm4, %v3859_v32, %v2073_v3 }
 0x67c   : > { %2130 = vst.msk [vmem:[%s4105_s25 + $0x38] sm:$0xff] %vm2122_vm5, %v2113_v61 }
 0x67e   : > { %v2071_v23 = vpop.permute.xlu0 %2070 }
 0x67f   : > { %v2112_v20 = vsel %vm1370_vm4, %v3857_v9, %v2071_v23 }
 0x680   : > { %2129 = vst.msk [vmem:[%s4105_s25 + $0x30] sm:$0xff] %vm2122_vm5, %v2112_v20 }
 0x682   : > { %v2077_v24 = vpop.permute.xlu0 %2076 }
 0x683   : > { %v2115_v60 = vsel %vm1370_vm4, %v3867_v56, %v2077_v24 }
 0x684   : > { %2132 = vst.msk [vmem:[%s4105_s25 + $0x48] sm:$0xff] %vm2122_vm5, %v2115_v60 }
 0x686   : > { %v2081_v10 = vpop.permute.xlu0 %2080 }
 0x687   : > { %v2117_v32 = vsel %vm1370_vm4, %v3875_v27, %v2081_v10 }
 0x688   : > { %2134 = vst.msk [vmem:[%s4105_s25 + $0x58] sm:$0xff] %vm2122_vm5, %v2117_v32 }
 0x68a   : > { %v2079_v4 = vpop.permute.xlu0 %2078 }
 0x68b   : > { %v2116_v9 = vsel %vm1370_vm4, %v3873_v25, %v2079_v4 }
 0x68c   : > { %2133 = vst.msk [vmem:[%s4105_s25 + $0x50] sm:$0xff] %vm2122_vm5, %v2116_v9 }
 0x68e   : > { %v2085_v31 = vpop.permute.xlu0 %2084 }
 0x68f   : > { %v2119_v56 = vsel %vm1370_vm4, %v3883_v39, %v2085_v31 }
 0x690   : > { %2136 = vst.msk [vmem:[%s4105_s25 + $0x68] sm:$0xff] %vm2122_vm5, %v2119_v56 }
 0x692   : > { %v2083_v26 = vpop.permute.xlu0 %2082 }
 0x693   : > { %v2118_v27 = vsel %vm1370_vm4, %v3881_v30, %v2083_v26 }
 0x694   : > { %2135 = vst.msk [vmem:[%s4105_s25 + $0x60] sm:$0xff] %vm2122_vm5, %v2118_v27 }
 0x696   : > { %v2087_v34 = vpop.permute.xlu0 %2086 }
 0x697   : > { %v2120_v25 = vsel %vm1370_vm4, %v3891_v38, %v2087_v34 }
 0x698   : > { %2137 = vst.msk [vmem:[%s4105_s25 + $0x70] sm:$0xff] %vm2122_vm5, %v2120_v25 }
 0x69a   : > { %v2089_v35 = vpop.permute.xlu0 %2088 }
 0x69b   : > { %v2121_v39 = vsel %vm1370_vm4, %v3885_v47, %v2089_v35 }
 0x69c   : > { %2138 = vst.msk [vmem:[%s4105_s25 + $0x78] sm:$0xff] %vm2122_vm5, %v2121_v39  ;;  %s2383_s25 = scalar_lea.sflag [#allocation3], %s402_s13 }
 0x724   : > { %v2366_v54 = vpop.f32.mrf.mxu0 }
 0x725   : > { %v2622_v55 = vmul.f32 -1.442695, %v2366_v54 }
 0x726   : > { %v3129_v57 = vpop.f32.mrf.mxu0 }
 0x727   : > { %3273 = vpow2.f32 %v2622_v55 }
 0x734   : > { %v3274_v30 = vpop.eup %3273 }
 0x735   : > { %v2373_v58 = vadd.f32 1.0, %v3274_v30 }
 0x737   : > { %3275 = vrcp.f32 %v2373_v58 }
 0x744   : > { %v3276_v47 = vpop.eup %3275 }
 0x745   : > { %2376 = vst [vmem:[%s404_s15] sm:$0xff] %v3276_v47 }
 0x746   : > { %3307 = shalt.err (!%p3304_p3)
}
 0x747   : > { %s3308_s12 = scalar_lea.hbm %s4180_s29, 128  ;;  %s3312_s0 = scalar_lea.hbm %s4226_s11, 256 }
 0x748   : > { %p3309_p4 = scmp.ne.s32.totalorder %s4180_s29, %s3308_s12  ;;  %p3313_p9 = scmp.lt.s32.totalorder %s4180_s29, %s4226_s11 }
 0x749   : > { %p3314_p10 = scmp.lt.s32.totalorder %s3312_s0, %s3308_s12 }
 0x74a   : > { %p3310_p7 = pnand %p3309_p4, %p3459_p5 }
 0x74b   : > { %p3315_p11 = por %p3314_p10, %p3313_p9 }
 0x74c   : > { %p3311_p8 = pneg %p3310_p7 }
 0x74e   : > { %p3316_p12 = pnand %p3315_p11, %p3311_p8 }
 0x750   : > { %3319 = shalt.err (!%p3316_p12)
}
 0x751   : > { %3130 = dma.vmem_to_hbm [thread:$0]  (%p3459_p5), %s2401_s16, 128, %s4180_s29, %s2383_s25  }
 0x752 PF: > { %p3136_p13 = scmp.ge.s32.totalorder %s3354_s20, 2  ;;  %s2420_s1 = sand.u32 1, %s3342_s17  }
 0x753   : > { %s2421_s24 = scalar_lea.sflag [#allocation3], %s2420_s1 }
 0x754   : > { %p3133_p0 = pnand %p3136_p13, %p3463_p6 }
 0x756   : > { %p3134_p1 = pneg %p3133_p0 }
 0x758   : > { %3337 = dma.done.wait (%p3134_p1), %s2421_s24, 128  }
 0x759   : > { %3339 = vsyncadd (%p3134_p1), %s2421_s24, 4294967168  ;;  %p22_p2 = scmp.ge.s32.totalorder %s3446_s23, 4   ;;  %s4233_s17 = smov %s3346_s18 }
 0x75a   : > { %s4234_s18 = smov %s3350_s19  ;;  %s4235_s19 = smov %s3457_s26 }
 0x75b   : > { %s4236_s20 = smov %s3446_s23  ;;  %24 = sbr.rel (!%p22_p2) target bundleno = 6 (0x6), region = 110 }
 0x760   :  { %2426 = vsyncpa [#allocation3], 1 }
 0x761   :  { %2428 = vsyncpa [#allocation3 + $0x1], 1 }

</bundles_post_ra>
